<compile_context>
chip_gen: v6e
topology: v6e:2x2x1
jax: 0.10.0
libtpu: 0.0.40
codegen_flags: <defaults>
</compile_context>

<pallas_src>
import functools

import jax
import jax.numpy as jnp
from jax import lax
from jax.experimental import pallas as pl
from jax.experimental.pallas import tpu as pltpu


def _lstm_kernel(x_ref, h0_ref, c0_ref,
                 wih0_ref, b0_ref, whh0_ref, w1cat_ref, b1_ref,
                 wl_ref, bl_ref,
                 y_ref, state_ref,
                 xw0_scr, h1_scr, stage_scr,
                 *, hidden_dim):
    H = hidden_dim
    T, B, _ = x_ref.shape
    G = 4 * H

    # Hoisted constants (loop is fully unrolled; JAX does not CSE broadcasts).
    lane = lax.broadcasted_iota(jnp.int32, (B, G), 1)
    is_g = (lane >= 2 * H) & (lane < 3 * H)                       # cell-gate lanes
    gate_scale = jnp.where(is_g, 2.0, 1.0).astype(jnp.float32)    # x2 on g lanes
    gate_shift = jnp.where(is_g, -1.0, 0.0).astype(jnp.float32)   # -1 on g lanes
    b1_full = jnp.broadcast_to(b1_ref[...], (B, G))

    # Layer-0 input projection for every timestep (F == 1 => pure VPU
    # broadcast-multiply), staged in VMEM so it does not pin 8 vregs across
    # the unrolled recurrence:  xw0[t] = x[t] * W_ih_l0^T + (b_ih_l0 + b_hh_l0)
    xw0_scr[...] = x_ref[...] * wih0_ref[...] + b0_ref[...]       # (T, B, 4H)

    def activate(pre):
        # One EUP pass: sigmoid on (i, f, o) lanes, tanh on cell-gate lanes via
        # tanh(x) = 2*sigmoid(2x) - 1, expressed as scale/shift on full vregs.
        s = jax.nn.sigmoid(pre * gate_scale)
        return s * gate_scale + gate_shift

    def cell(a, c_prev):
        # Quarter-lane slices lower to single XLU lane-rotates (XLU slot is
        # otherwise idle here); VPU op count matches a roll-based variant.
        i = a[:, 0:H]
        f = a[:, H:2 * H]
        g = a[:, 2 * H:3 * H]
        o = a[:, 3 * H:4 * H]
        c_new = f * c_prev + i * g
        return o * jnp.tanh(c_new), c_new

    h0 = h0_ref[0]
    c0 = c0_ref[0]
    h1 = h0_ref[1]
    c1 = c0_ref[1]

    # Prime the layer-1 staging buffer with h1(t = -1).
    stage_scr[:, H:] = h1

    # Fully unrolled time loop (T is a compile-time constant).
    for t in range(T):
        # ----- layer 0: single K=H, N=4H push; only cross-step dependency is
        #       h0, so layer 0 of step t+1 overlaps layer 1 of step t. -----
        hh0 = jnp.dot(h0, whh0_ref[...], preferred_element_type=jnp.float32)
        a0 = activate(xw0_scr[t] + hh0)
        h0, c0 = cell(a0, c0)

        # ----- layer 1: one fused [W_ih_l1; W_hh_l1] push (K=2H, N=4H) fed by
        #       the persistent staging buffer: lanes [0:H)=h0(t), [H:2H)=h1(t-1).
        stage_scr[:, :H] = h0
        pre1 = jnp.dot(stage_scr[...], w1cat_ref[...],
                       preferred_element_type=jnp.float32) + b1_full
        a1 = activate(pre1)
        h1, c1 = cell(a1, c1)
        stage_scr[:, H:] = h1          # feeds step t+1; off next step's L0 path

        h1_scr[t] = h1                 # stash for the head; off the recurrence

    # Linear head once, outside the loop: one batched lane-reduce + one store.
    y = jnp.sum(h1_scr[...] * wl_ref[...], axis=-1) + bl_ref[...]
    y_ref[...] = y

    # Final state packed into a single lane-dense (B, 4H) tile: [h0|h1|c0|c1].
    state_ref[...] = jnp.concatenate([h0, h1, c0, c1], axis=1)


def init_params(key, input_dim, hidden_dim):
    """Deterministic init mimicking PyTorch's U(-1/sqrt(H), 1/sqrt(H))."""
    H = hidden_dim
    k = 1.0 / (H ** 0.5)
    keys = jax.random.split(key, 10)

    def u(k_, shape):
        return jax.random.uniform(k_, shape, jnp.float32, -k, k)

    w_ih_l0 = u(keys[0], (4 * H, input_dim))
    w_hh_l0 = u(keys[1], (4 * H, H))
    b_ih_l0 = u(keys[2], (4 * H,))
    b_hh_l0 = u(keys[3], (4 * H,))
    w_ih_l1 = u(keys[4], (4 * H, H))
    w_hh_l1 = u(keys[5], (4 * H, H))
    b_ih_l1 = u(keys[6], (4 * H,))
    b_hh_l1 = u(keys[7], (4 * H,))
    w_lin = u(keys[8], (1, H))
    b_lin = u(keys[9], (1,))

    wih1_t = w_ih_l1.T                     # (H, 4H)
    whh1_t = w_hh_l1.T                     # (H, 4H)

    return dict(
        # Kernel-side (pre-transposed / pre-fused) parameters.
        wih0_3d=w_ih_l0.T.reshape(1, 1, 4 * H),            # valid since F == 1
        b0_3d=(b_ih_l0 + b_hh_l0).reshape(1, 1, 4 * H),
        whh0_t=w_hh_l0.T,                                  # (H, 4H)
        w1_cat=jnp.concatenate([wih1_t, whh1_t], axis=0),  # (2H, 4H)
        b1=(b_ih_l1 + b_hh_l1).reshape(1, 4 * H),
        wl=w_lin.reshape(1, 1, H),
        bl=b_lin.reshape(1, 1),
        # Plain pre-transposed params for the pure-JAX reference.
        wih0_t=w_ih_l0.T,
        b0=(b_ih_l0 + b_hh_l0).reshape(1, 4 * H),
        wih1_t=wih1_t,
        whh1_t=whh1_t,
        wl_t=w_lin.T,
    )


def my_lstm_forward(x, hidden, params, hidden_dim):
    """Equivalent of myLSTM.forward(input, hidden)."""
    h0, c0 = hidden
    T, B, F = x.shape
    L = h0.shape[0]
    H = hidden_dim
    assert L == 2, "kernel implements num_layers=2 (the module default)"
    assert F == 1, "module docstring: expect features = 1"

    # Pad batch to a full f32 sublane group (8).  Rows are independent in an
    # LSTM, so padded rows are discarded after the kernel.
    B_pad = max(8, ((B + 7) // 8) * 8)
    if B_pad != B:
        x_p = jnp.pad(x, ((0, 0), (0, B_pad - B), (0, 0)))
        h0_p = jnp.pad(h0, ((0, 0), (0, B_pad - B), (0, 0)))
        c0_p = jnp.pad(c0, ((0, 0), (0, B_pad - B), (0, 0)))
    else:
        x_p, h0_p, c0_p = x, h0, c0

    kernel = functools.partial(_lstm_kernel, hidden_dim=H)
    vmem = pl.BlockSpec(memory_space=pltpu.MemorySpace.VMEM)

    y, state = pl.pallas_call(
        kernel,
        out_shape=(
            jax.ShapeDtypeStruct((T, B_pad), jnp.float32),
            jax.ShapeDtypeStruct((B_pad, 4 * H), jnp.float32),   # [h0|h1|c0|c1]
        ),
        in_specs=[vmem] * 10,
        out_specs=(vmem, vmem),
        scratch_shapes=[
            pltpu.VMEM((T, B_pad, 4 * H), jnp.float32),  # staged xw0
            pltpu.VMEM((T, B_pad, H), jnp.float32),      # per-step h1 stash
            pltpu.VMEM((B_pad, 2 * H), jnp.float32),     # layer-1 [h0(t)|h1(t-1)]
        ],
    )(x_p, h0_p, c0_p,
      params['wih0_3d'], params['b0_3d'], params['whh0_t'],
      params['w1_cat'], params['b1'],
      params['wl'], params['bl'])

    # Unpack the lane-dense state slab.
    hN = jnp.stack([state[:B, 0:H], state[:B, H:2 * H]])
    cN = jnp.stack([state[:B, 2 * H:3 * H], state[:B, 3 * H:4 * H]])
    return y[:, :B], (hN, cN)


def reference_forward(x, hidden, params, hidden_dim):
    """Pure-JAX reference with identical math, for validation."""
    H = hidden_dim
    h, c = hidden

    def cell(x_t, h_, c_, wih, whh, b):
        g = x_t @ wih + h_ @ whh + b
        i = jax.nn.sigmoid(g[:, :H])
        f = jax.nn.sigmoid(g[:, H:2 * H])
        gg = jnp.tanh(g[:, 2 * H:3 * H])
        o = jax.nn.sigmoid(g[:, 3 * H:])
        c_new = f * c_ + i * gg
        return o * jnp.tanh(c_new), c_new

    h0, c0, h1, c1 = h[0], c[0], h[1], c[1]
    ys = []
    for t in range(x.shape[0]):
        h0, c0 = cell(x[t], h0, c0, params['wih0_t'], params['whh0_t'], params['b0'])
        h1, c1 = cell(h0, h1, c1, params['wih1_t'], params['whh1_t'], params['b1'])
        ys.append(h1 @ params['wl_t'] + params['bl'])
    y = jnp.stack(ys)[..., 0]
    return y, (jnp.stack([h0, h1]), jnp.stack([c0, c1]))


if __name__ == "__main__":
    input_dim, hidden_dim, num_layers = 1, 32, 2
    seq_len, batch = 8, 2

    root = jax.random.PRNGKey(0)
    k_params, k_x = jax.random.split(root)

    params = init_params(k_params, input_dim, hidden_dim)
    # whh0_t is shared by kernel and reference.
    params['whh0_t'] = params['whh0_t']

    x = jax.random.normal(k_x, (seq_len, batch, input_dim), jnp.float32)
    # init_hidden(): zeros
    h0 = jnp.zeros((num_layers, batch, hidden_dim), jnp.float32)
    c0 = jnp.zeros((num_layers, batch, hidden_dim), jnp.float32)

    y, (hN, cN) = my_lstm_forward(x, (h0, c0), params, hidden_dim)
    jax.block_until_ready((y, hN, cN))

    y_ref, (hN_ref, cN_ref) = reference_forward(x, (h0, c0), params, hidden_dim)
    assert y.shape == (seq_len, batch)
    assert jnp.allclose(y, y_ref, atol=1e-3, rtol=1e-3)
    assert jnp.allclose(hN, hN_ref, atol=1e-3, rtol=1e-3)
    assert jnp.allclose(cN, cN_ref, atol=1e-3, rtol=1e-3)

    print("KERNEL_OK")
</pallas_src>

<mosaic_0001>
module attributes {stable_mosaic.version = 11 : i64} {
  func.func @_lstm_kernel(%arg0: memref<8x8x1xf32, #tpu.memory_space<vmem>>, %arg1: memref<2x8x32xf32, #tpu.memory_space<vmem>>, %arg2: memref<2x8x32xf32, #tpu.memory_space<vmem>>, %arg3: memref<1x1x128xf32, #tpu.memory_space<vmem>>, %arg4: memref<1x1x128xf32, #tpu.memory_space<vmem>>, %arg5: memref<32x128xf32, #tpu.memory_space<vmem>>, %arg6: memref<64x128xf32, #tpu.memory_space<vmem>>, %arg7: memref<1x128xf32, #tpu.memory_space<vmem>>, %arg8: memref<1x1x32xf32, #tpu.memory_space<vmem>>, %arg9: memref<1x1xf32, #tpu.memory_space<vmem>>, %arg10: memref<8x8xf32, #tpu.memory_space<vmem>>, %arg11: memref<8x128xf32, #tpu.memory_space<vmem>>, %arg12: memref<8x8x128xf32, #tpu.memory_space<vmem>>, %arg13: memref<8x8x32xf32, #tpu.memory_space<vmem>>, %arg14: memref<8x64xf32, #tpu.memory_space<vmem>>) attributes {dimension_semantics = [], scalar_prefetch = 0 : i64, scratch_operands = 3 : i64, tpu.core_type = #tpu.core_type<tc>} {
    %0 = tpu.iota {dimensions = array<i32: 1>} : vector<8x128xi32>
    %c64_i32 = arith.constant 64 : i32
    %1 = vector.broadcast %c64_i32 : i32 to vector<8x128xi32>
    %2 = arith.cmpi sge, %0, %1 : vector<8x128xi32>
    %c96_i32 = arith.constant 96 : i32
    %3 = vector.broadcast %c96_i32 : i32 to vector<8x128xi32>
    %4 = arith.cmpi slt, %0, %3 : vector<8x128xi32>
    %5 = arith.andi %2, %4 : vector<8x128xi1>
    %cst = arith.constant 2.000000e+00 : f32
    %cst_0 = arith.constant 1.000000e+00 : f32
    %6 = vector.broadcast %cst : f32 to vector<8x128xf32>
    %7 = vector.broadcast %cst_0 : f32 to vector<8x128xf32>
    %8 = arith.select %5, %6, %7 : vector<8x128xi1>, vector<8x128xf32>
    %cst_1 = arith.constant -1.000000e+00 : f32
    %cst_2 = arith.constant 0.000000e+00 : f32
    %9 = vector.broadcast %cst_1 : f32 to vector<8x128xf32>
    %10 = vector.broadcast %cst_2 : f32 to vector<8x128xf32>
    %11 = arith.select %5, %9, %10 : vector<8x128xi1>, vector<8x128xf32>
    %c0 = arith.constant 0 : index
    %c0_3 = arith.constant 0 : index
    %12 = vector.load %arg7[%c0, %c0_3] : memref<1x128xf32, #tpu.memory_space<vmem>>, vector<1x128xf32>
    %13 = vector.shape_cast %12 : vector<1x128xf32> to vector<1x128xf32>
    %14 = vector.broadcast %13 : vector<1x128xf32> to vector<8x128xf32>
    %c0_4 = arith.constant 0 : index
    %c0_5 = arith.constant 0 : index
    %c0_6 = arith.constant 0 : index
    %15 = vector.load %arg0[%c0_4, %c0_5, %c0_6] : memref<8x8x1xf32, #tpu.memory_space<vmem>>, vector<8x8x1xf32>
    %c0_7 = arith.constant 0 : index
    %c0_8 = arith.constant 0 : index
    %c0_9 = arith.constant 0 : index
    %16 = vector.load %arg3[%c0_7, %c0_8, %c0_9] : memref<1x1x128xf32, #tpu.memory_space<vmem>>, vector<1x1x128xf32>
    %17 = vector.broadcast %15 : vector<8x8x1xf32> to vector<8x8x128xf32>
    %18 = vector.broadcast %16 : vector<1x1x128xf32> to vector<8x8x128xf32>
    %19 = arith.mulf %17, %18 : vector<8x8x128xf32>
    %c0_10 = arith.constant 0 : index
    %c0_11 = arith.constant 0 : index
    %c0_12 = arith.constant 0 : index
    %20 = vector.load %arg4[%c0_10, %c0_11, %c0_12] : memref<1x1x128xf32, #tpu.memory_space<vmem>>, vector<1x1x128xf32>
    %21 = vector.broadcast %20 : vector<1x1x128xf32> to vector<8x8x128xf32>
    %22 = arith.addf %19, %21 : vector<8x8x128xf32>
    %c0_13 = arith.constant 0 : index
    %c0_14 = arith.constant 0 : index
    %c0_15 = arith.constant 0 : index
    %23 = vector.load %arg12[%c0_13, %c0_14, %c0_15] : memref<8x8x128xf32, #tpu.memory_space<vmem>>, vector<8x8x128xf32>
    tpu.vector_store %arg12[%c0_13, %c0_14, %c0_15], %22 {strides = array<i32>} : memref<8x8x128xf32, #tpu.memory_space<vmem>>, vector<8x8x128xf32>,
    %c0_16 = arith.constant 0 : index
    %c0_17 = arith.constant 0 : index
    %c0_18 = arith.constant 0 : index
    %24 = vector.load %arg1[%c0_16, %c0_17, %c0_18] : memref<2x8x32xf32, #tpu.memory_space<vmem>>, vector<1x8x32xf32>
    %25 = vector.shape_cast %24 : vector<1x8x32xf32> to vector<8x32xf32>
    %c0_19 = arith.constant 0 : index
    %c0_20 = arith.constant 0 : index
    %c0_21 = arith.constant 0 : index
    %26 = vector.load %arg2[%c0_19, %c0_20, %c0_21] : memref<2x8x32xf32, #tpu.memory_space<vmem>>, vector<1x8x32xf32>
    %27 = vector.shape_cast %26 : vector<1x8x32xf32> to vector<8x32xf32>
    %c1 = arith.constant 1 : index
    %c0_22 = arith.constant 0 : index
    %c0_23 = arith.constant 0 : index
    %28 = vector.load %arg1[%c1, %c0_22, %c0_23] : memref<2x8x32xf32, #tpu.memory_space<vmem>>, vector<1x8x32xf32>
    %29 = vector.shape_cast %28 : vector<1x8x32xf32> to vector<8x32xf32>
    %c1_24 = arith.constant 1 : index
    %c0_25 = arith.constant 0 : index
    %c0_26 = arith.constant 0 : index
    %30 = vector.load %arg2[%c1_24, %c0_25, %c0_26] : memref<2x8x32xf32, #tpu.memory_space<vmem>>, vector<1x8x32xf32>
    %31 = vector.shape_cast %30 : vector<1x8x32xf32> to vector<8x32xf32>
    %c0_27 = arith.constant 0 : index
    %c32 = arith.constant 32 : index
    %32 = vector.load %arg14[%c0_27, %c32] : memref<8x64xf32, #tpu.memory_space<vmem>>, vector<8x32xf32>
    tpu.vector_store %arg14[%c0_27, %c32], %29 {strides = array<i32>} : memref<8x64xf32, #tpu.memory_space<vmem>>, vector<8x32xf32>,
    %c0_28 = arith.constant 0 : index
    %c0_29 = arith.constant 0 : index
    %33 = vector.load %arg5[%c0_28, %c0_29] : memref<32x128xf32, #tpu.memory_space<vmem>>, vector<32x128xf32>
    %cst_30 = arith.constant dense<0.000000e+00> : vector<8x128xf32>
    %34 = tpu.matmul %25, %33, %cst_30 {dimension_numbers = #tpu.dot_dimension_numbers<[1], [0], [0], [1], [0, 0, 1, 1], [], []>} : vector<8x32xf32>, vector<32x128xf32>, vector<8x128xf32> -> vector<8x128xf32>
    %c0_31 = arith.constant 0 : index
    %c0_32 = arith.constant 0 : index
    %c0_33 = arith.constant 0 : index
    %35 = vector.load %arg12[%c0_31, %c0_32, %c0_33] : memref<8x8x128xf32, #tpu.memory_space<vmem>>, vector<1x8x128xf32>
    %36 = vector.shape_cast %35 : vector<1x8x128xf32> to vector<8x128xf32>
    %37 = arith.addf %36, %34 : vector<8x128xf32>
    %38 = arith.mulf %37, %8 : vector<8x128xf32>
    %39 = arith.negf %38 : vector<8x128xf32>
    %40 = math.exp %39 : vector<8x128xf32>
    %cst_34 = arith.constant 1.000000e+00 : f32
    %41 = vector.broadcast %cst_34 : f32 to vector<8x128xf32>
    %42 = arith.addf %41, %40 : vector<8x128xf32>
    %43 = arith.divf %41, %42 : vector<8x128xf32>
    %44 = arith.mulf %43, %8 : vector<8x128xf32>
    %45 = arith.addf %44, %11 : vector<8x128xf32>
    %46 = vector.extract_strided_slice %45 {offsets = [0, 0], sizes = [8, 32], strides = [1, 1]} : vector<8x128xf32> to vector<8x32xf32>
    %47 = vector.extract_strided_slice %45 {offsets = [0, 32], sizes = [8, 32], strides = [1, 1]} : vector<8x128xf32> to vector<8x32xf32>
    %48 = vector.extract_strided_slice %45 {offsets = [0, 64], sizes = [8, 32], strides = [1, 1]} : vector<8x128xf32> to vector<8x32xf32>
    %49 = vector.extract_strided_slice %45 {offsets = [0, 96], sizes = [8, 32], strides = [1, 1]} : vector<8x128xf32> to vector<8x32xf32>
    %50 = arith.mulf %47, %27 : vector<8x32xf32>
    %51 = arith.mulf %46, %48 : vector<8x32xf32>
    %52 = arith.addf %50, %51 : vector<8x32xf32>
    %53 = math.tanh %52 : vector<8x32xf32>
    %54 = arith.mulf %49, %53 : vector<8x32xf32>
    %c0_35 = arith.constant 0 : index
    %c0_36 = arith.constant 0 : index
    %55 = vector.load %arg14[%c0_35, %c0_36] : memref<8x64xf32, #tpu.memory_space<vmem>>, vector<8x32xf32>
    tpu.vector_store %arg14[%c0_35, %c0_36], %54 {strides = array<i32>} : memref<8x64xf32, #tpu.memory_space<vmem>>, vector<8x32xf32>,
    %c0_37 = arith.constant 0 : index
    %c0_38 = arith.constant 0 : index
    %56 = vector.load %arg14[%c0_37, %c0_38] : memref<8x64xf32, #tpu.memory_space<vmem>>, vector<8x64xf32>
    %c0_39 = arith.constant 0 : index
    %c0_40 = arith.constant 0 : index
    %57 = vector.load %arg6[%c0_39, %c0_40] : memref<64x128xf32, #tpu.memory_space<vmem>>, vector<64x128xf32>
    %cst_41 = arith.constant dense<0.000000e+00> : vector<8x128xf32>
    %58 = tpu.matmul %56, %57, %cst_41 {dimension_numbers = #tpu.dot_dimension_numbers<[1], [0], [0], [1], [0, 0, 1, 1], [], []>} : vector<8x64xf32>, vector<64x128xf32>, vector<8x128xf32> -> vector<8x128xf32>
    %59 = arith.addf %58, %14 : vector<8x128xf32>
    %60 = arith.mulf %59, %8 : vector<8x128xf32>
    %61 = arith.negf %60 : vector<8x128xf32>
    %62 = math.exp %61 : vector<8x128xf32>
    %cst_42 = arith.constant 1.000000e+00 : f32
    %63 = vector.broadcast %cst_42 : f32 to vector<8x128xf32>
    %64 = arith.addf %63, %62 : vector<8x128xf32>
    %65 = arith.divf %63, %64 : vector<8x128xf32>
    %66 = arith.mulf %65, %8 : vector<8x128xf32>
    %67 = arith.addf %66, %11 : vector<8x128xf32>
    %68 = vector.extract_strided_slice %67 {offsets = [0, 0], sizes = [8, 32], strides = [1, 1]} : vector<8x128xf32> to vector<8x32xf32>
    %69 = vector.extract_strided_slice %67 {offsets = [0, 32], sizes = [8, 32], strides = [1, 1]} : vector<8x128xf32> to vector<8x32xf32>
    %70 = vector.extract_strided_slice %67 {offsets = [0, 64], sizes = [8, 32], strides = [1, 1]} : vector<8x128xf32> to vector<8x32xf32>
    %71 = vector.extract_strided_slice %67 {offsets = [0, 96], sizes = [8, 32], strides = [1, 1]} : vector<8x128xf32> to vector<8x32xf32>
    %72 = arith.mulf %69, %31 : vector<8x32xf32>
    %73 = arith.mulf %68, %70 : vector<8x32xf32>
    %74 = arith.addf %72, %73 : vector<8x32xf32>
    %75 = math.tanh %74 : vector<8x32xf32>
    %76 = arith.mulf %71, %75 : vector<8x32xf32>
    %c0_43 = arith.constant 0 : index
    %c32_44 = arith.constant 32 : index
    %77 = vector.load %arg14[%c0_43, %c32_44] : memref<8x64xf32, #tpu.memory_space<vmem>>, vector<8x32xf32>
    tpu.vector_store %arg14[%c0_43, %c32_44], %76 {strides = array<i32>} : memref<8x64xf32, #tpu.memory_space<vmem>>, vector<8x32xf32>,
    %c0_45 = arith.constant 0 : index
    %c0_46 = arith.constant 0 : index
    %c0_47 = arith.constant 0 : index
    %78 = vector.load %arg13[%c0_45, %c0_46, %c0_47] : memref<8x8x32xf32, #tpu.memory_space<vmem>>, vector<1x8x32xf32>
    %79 = vector.shape_cast %78 : vector<1x8x32xf32> to vector<8x32xf32>
    %80 = vector.shape_cast %76 : vector<8x32xf32> to vector<1x8x32xf32>
    tpu.vector_store %arg13[%c0_45, %c0_46, %c0_47], %80 {strides = array<i32>} : memref<8x8x32xf32, #tpu.memory_space<vmem>>, vector<1x8x32xf32>,
    %c0_48 = arith.constant 0 : index
    %c0_49 = arith.constant 0 : index
    %81 = vector.load %arg5[%c0_48, %c0_49] : memref<32x128xf32, #tpu.memory_space<vmem>>, vector<32x128xf32>
    %cst_50 = arith.constant dense<0.000000e+00> : vector<8x128xf32>
    %82 = tpu.matmul %54, %81, %cst_50 {dimension_numbers = #tpu.dot_dimension_numbers<[1], [0], [0], [1], [0, 0, 1, 1], [], []>} : vector<8x32xf32>, vector<32x128xf32>, vector<8x128xf32> -> vector<8x128xf32>
    %c1_51 = arith.constant 1 : index
    %c0_52 = arith.constant 0 : index
    %c0_53 = arith.constant 0 : index
    %83 = vector.load %arg12[%c1_51, %c0_52, %c0_53] : memref<8x8x128xf32, #tpu.memory_space<vmem>>, vector<1x8x128xf32>
    %84 = vector.shape_cast %83 : vector<1x8x128xf32> to vector<8x128xf32>
    %85 = arith.addf %84, %82 : vector<8x128xf32>
    %86 = arith.mulf %85, %8 : vector<8x128xf32>
    %87 = arith.negf %86 : vector<8x128xf32>
    %88 = math.exp %87 : vector<8x128xf32>
    %cst_54 = arith.constant 1.000000e+00 : f32
    %89 = vector.broadcast %cst_54 : f32 to vector<8x128xf32>
    %90 = arith.addf %89, %88 : vector<8x128xf32>
    %91 = arith.divf %89, %90 : vector<8x128xf32>
    %92 = arith.mulf %91, %8 : vector<8x128xf32>
    %93 = arith.addf %92, %11 : vector<8x128xf32>
    %94 = vector.extract_strided_slice %93 {offsets = [0, 0], sizes = [8, 32], strides = [1, 1]} : vector<8x128xf32> to vector<8x32xf32>
    %95 = vector.extract_strided_slice %93 {offsets = [0, 32], sizes = [8, 32], strides = [1, 1]} : vector<8x128xf32> to vector<8x32xf32>
    %96 = vector.extract_strided_slice %93 {offsets = [0, 64], sizes = [8, 32], strides = [1, 1]} : vector<8x128xf32> to vector<8x32xf32>
    %97 = vector.extract_strided_slice %93 {offsets = [0, 96], sizes = [8, 32], strides = [1, 1]} : vector<8x128xf32> to vector<8x32xf32>
    %98 = arith.mulf %95, %52 : vector<8x32xf32>
    %99 = arith.mulf %94, %96 : vector<8x32xf32>
    %100 = arith.addf %98, %99 : vector<8x32xf32>
    %101 = math.tanh %100 : vector<8x32xf32>
    %102 = arith.mulf %97, %101 : vector<8x32xf32>
    %c0_55 = arith.constant 0 : index
    %c0_56 = arith.constant 0 : index
    %103 = vector.load %arg14[%c0_55, %c0_56] : memref<8x64xf32, #tpu.memory_space<vmem>>, vector<8x32xf32>
    tpu.vector_store %arg14[%c0_55, %c0_56], %102 {strides = array<i32>} : memref<8x64xf32, #tpu.memory_space<vmem>>, vector<8x32xf32>,
    %c0_57 = arith.constant 0 : index
    %c0_58 = arith.constant 0 : index
    %104 = vector.load %arg14[%c0_57, %c0_58] : memref<8x64xf32, #tpu.memory_space<vmem>>, vector<8x64xf32>
    %c0_59 = arith.constant 0 : index
    %c0_60 = arith.constant 0 : index
    %105 = vector.load %arg6[%c0_59, %c0_60] : memref<64x128xf32, #tpu.memory_space<vmem>>, vector<64x128xf32>
    %cst_61 = arith.constant dense<0.000000e+00> : vector<8x128xf32>
    %106 = tpu.matmul %104, %105, %cst_61 {dimension_numbers = #tpu.dot_dimension_numbers<[1], [0], [0], [1], [0, 0, 1, 1], [], []>} : vector<8x64xf32>, vector<64x128xf32>, vector<8x128xf32> -> vector<8x128xf32>
    %107 = arith.addf %106, %14 : vector<8x128xf32>
    %108 = arith.mulf %107, %8 : vector<8x128xf32>
    %109 = arith.negf %108 : vector<8x128xf32>
    %110 = math.exp %109 : vector<8x128xf32>
    %cst_62 = arith.constant 1.000000e+00 : f32
    %111 = vector.broadcast %cst_62 : f32 to vector<8x128xf32>
    %112 = arith.addf %111, %110 : vector<8x128xf32>
    %113 = arith.divf %111, %112 : vector<8x128xf32>
    %114 = arith.mulf %113, %8 : vector<8x128xf32>
    %115 = arith.addf %114, %11 : vector<8x128xf32>
    %116 = vector.extract_strided_slice %115 {offsets = [0, 0], sizes = [8, 32], strides = [1, 1]} : vector<8x128xf32> to vector<8x32xf32>
    %117 = vector.extract_strided_slice %115 {offsets = [0, 32], sizes = [8, 32], strides = [1, 1]} : vector<8x128xf32> to vector<8x32xf32>
    %118 = vector.extract_strided_slice %115 {offsets = [0, 64], sizes = [8, 32], strides = [1, 1]} : vector<8x128xf32> to vector<8x32xf32>
    %119 = vector.extract_strided_slice %115 {offsets = [0, 96], sizes = [8, 32], strides = [1, 1]} : vector<8x128xf32> to vector<8x32xf32>
    %120 = arith.mulf %117, %74 : vector<8x32xf32>
    %121 = arith.mulf %116, %118 : vector<8x32xf32>
    %122 = arith.addf %120, %121 : vector<8x32xf32>
    %123 = math.tanh %122 : vector<8x32xf32>
    %124 = arith.mulf %119, %123 : vector<8x32xf32>
    %c0_63 = arith.constant 0 : index
    %c32_64 = arith.constant 32 : index
    %125 = vector.load %arg14[%c0_63, %c32_64] : memref<8x64xf32, #tpu.memory_space<vmem>>, vector<8x32xf32>
    tpu.vector_store %arg14[%c0_63, %c32_64], %124 {strides = array<i32>} : memref<8x64xf32, #tpu.memory_space<vmem>>, vector<8x32xf32>,
    %c1_65 = arith.constant 1 : index
    %c0_66 = arith.constant 0 : index
    %c0_67 = arith.constant 0 : index
    %126 = vector.load %arg13[%c1_65, %c0_66, %c0_67] : memref<8x8x32xf32, #tpu.memory_space<vmem>>, vector<1x8x32xf32>
    %127 = vector.shape_cast %126 : vector<1x8x32xf32> to vector<8x32xf32>
    %128 = vector.shape_cast %124 : vector<8x32xf32> to vector<1x8x32xf32>
    tpu.vector_store %arg13[%c1_65, %c0_66, %c0_67], %128 {strides = array<i32>} : memref<8x8x32xf32, #tpu.memory_space<vmem>>, vector<1x8x32xf32>,
    %c0_68 = arith.constant 0 : index
    %c0_69 = arith.constant 0 : index
    %129 = vector.load %arg5[%c0_68, %c0_69] : memref<32x128xf32, #tpu.memory_space<vmem>>, vector<32x128xf32>
    %cst_70 = arith.constant dense<0.000000e+00> : vector<8x128xf32>
    %130 = tpu.matmul %102, %129, %cst_70 {dimension_numbers = #tpu.dot_dimension_numbers<[1], [0], [0], [1], [0, 0, 1, 1], [], []>} : vector<8x32xf32>, vector<32x128xf32>, vector<8x128xf32> -> vector<8x128xf32>
    %c2 = arith.constant 2 : index
    %c0_71 = arith.constant 0 : index
    %c0_72 = arith.constant 0 : index
    %131 = vector.load %arg12[%c2, %c0_71, %c0_72] : memref<8x8x128xf32, #tpu.memory_space<vmem>>, vector<1x8x128xf32>
    %132 = vector.shape_cast %131 : vector<1x8x128xf32> to vector<8x128xf32>
    %133 = arith.addf %132, %130 : vector<8x128xf32>
    %134 = arith.mulf %133, %8 : vector<8x128xf32>
    %135 = arith.negf %134 : vector<8x128xf32>
    %136 = math.exp %135 : vector<8x128xf32>
    %cst_73 = arith.constant 1.000000e+00 : f32
    %137 = vector.broadcast %cst_73 : f32 to vector<8x128xf32>
    %138 = arith.addf %137, %136 : vector<8x128xf32>
    %139 = arith.divf %137, %138 : vector<8x128xf32>
    %140 = arith.mulf %139, %8 : vector<8x128xf32>
    %141 = arith.addf %140, %11 : vector<8x128xf32>
    %142 = vector.extract_strided_slice %141 {offsets = [0, 0], sizes = [8, 32], strides = [1, 1]} : vector<8x128xf32> to vector<8x32xf32>
    %143 = vector.extract_strided_slice %141 {offsets = [0, 32], sizes = [8, 32], strides = [1, 1]} : vector<8x128xf32> to vector<8x32xf32>
    %144 = vector.extract_strided_slice %141 {offsets = [0, 64], sizes = [8, 32], strides = [1, 1]} : vector<8x128xf32> to vector<8x32xf32>
    %145 = vector.extract_strided_slice %141 {offsets = [0, 96], sizes = [8, 32], strides = [1, 1]} : vector<8x128xf32> to vector<8x32xf32>
    %146 = arith.mulf %143, %100 : vector<8x32xf32>
    %147 = arith.mulf %142, %144 : vector<8x32xf32>
    %148 = arith.addf %146, %147 : vector<8x32xf32>
    %149 = math.tanh %148 : vector<8x32xf32>
    %150 = arith.mulf %145, %149 : vector<8x32xf32>
    %c0_74 = arith.constant 0 : index
    %c0_75 = arith.constant 0 : index
    %151 = vector.load %arg14[%c0_74, %c0_75] : memref<8x64xf32, #tpu.memory_space<vmem>>, vector<8x32xf32>
    tpu.vector_store %arg14[%c0_74, %c0_75], %150 {strides = array<i32>} : memref<8x64xf32, #tpu.memory_space<vmem>>, vector<8x32xf32>,
    %c0_76 = arith.constant 0 : index
    %c0_77 = arith.constant 0 : index
    %152 = vector.load %arg14[%c0_76, %c0_77] : memref<8x64xf32, #tpu.memory_space<vmem>>, vector<8x64xf32>
    %c0_78 = arith.constant 0 : index
    %c0_79 = arith.constant 0 : index
    %153 = vector.load %arg6[%c0_78, %c0_79] : memref<64x128xf32, #tpu.memory_space<vmem>>, vector<64x128xf32>
    %cst_80 = arith.constant dense<0.000000e+00> : vector<8x128xf32>
    %154 = tpu.matmul %152, %153, %cst_80 {dimension_numbers = #tpu.dot_dimension_numbers<[1], [0], [0], [1], [0, 0, 1, 1], [], []>} : vector<8x64xf32>, vector<64x128xf32>, vector<8x128xf32> -> vector<8x128xf32>
    %155 = arith.addf %154, %14 : vector<8x128xf32>
    %156 = arith.mulf %155, %8 : vector<8x128xf32>
    %157 = arith.negf %156 : vector<8x128xf32>
    %158 = math.exp %157 : vector<8x128xf32>
    %cst_81 = arith.constant 1.000000e+00 : f32
    %159 = vector.broadcast %cst_81 : f32 to vector<8x128xf32>
    %160 = arith.addf %159, %158 : vector<8x128xf32>
    %161 = arith.divf %159, %160 : vector<8x128xf32>
    %162 = arith.mulf %161, %8 : vector<8x128xf32>
    %163 = arith.addf %162, %11 : vector<8x128xf32>
    %164 = vector.extract_strided_slice %163 {offsets = [0, 0], sizes = [8, 32], strides = [1, 1]} : vector<8x128xf32> to vector<8x32xf32>
    %165 = vector.extract_strided_slice %163 {offsets = [0, 32], sizes = [8, 32], strides = [1, 1]} : vector<8x128xf32> to vector<8x32xf32>
    %166 = vector.extract_strided_slice %163 {offsets = [0, 64], sizes = [8, 32], strides = [1, 1]} : vector<8x128xf32> to vector<8x32xf32>
    %167 = vector.extract_strided_slice %163 {offsets = [0, 96], sizes = [8, 32], strides = [1, 1]} : vector<8x128xf32> to vector<8x32xf32>
    %168 = arith.mulf %165, %122 : vector<8x32xf32>
    %169 = arith.mulf %164, %166 : vector<8x32xf32>
    %170 = arith.addf %168, %169 : vector<8x32xf32>
    %171 = math.tanh %170 : vector<8x32xf32>
    %172 = arith.mulf %167, %171 : vector<8x32xf32>
    %c0_82 = arith.constant 0 : index
    %c32_83 = arith.constant 32 : index
    %173 = vector.load %arg14[%c0_82, %c32_83] : memref<8x64xf32, #tpu.memory_space<vmem>>, vector<8x32xf32>
    tpu.vector_store %arg14[%c0_82, %c32_83], %172 {strides = array<i32>} : memref<8x64xf32, #tpu.memory_space<vmem>>, vector<8x32xf32>,
    %c2_84 = arith.constant 2 : index
    %c0_85 = arith.constant 0 : index
    %c0_86 = arith.constant 0 : index
    %174 = vector.load %arg13[%c2_84, %c0_85, %c0_86] : memref<8x8x32xf32, #tpu.memory_space<vmem>>, vector<1x8x32xf32>
    %175 = vector.shape_cast %174 : vector<1x8x32xf32> to vector<8x32xf32>
    %176 = vector.shape_cast %172 : vector<8x32xf32> to vector<1x8x32xf32>
    tpu.vector_store %arg13[%c2_84, %c0_85, %c0_86], %176 {strides = array<i32>} : memref<8x8x32xf32, #tpu.memory_space<vmem>>, vector<1x8x32xf32>,
    %c0_87 = arith.constant 0 : index
    %c0_88 = arith.constant 0 : index
    %177 = vector.load %arg5[%c0_87, %c0_88] : memref<32x128xf32, #tpu.memory_space<vmem>>, vector<32x128xf32>
    %cst_89 = arith.constant dense<0.000000e+00> : vector<8x128xf32>
    %178 = tpu.matmul %150, %177, %cst_89 {dimension_numbers = #tpu.dot_dimension_numbers<[1], [0], [0], [1], [0, 0, 1, 1], [], []>} : vector<8x32xf32>, vector<32x128xf32>, vector<8x128xf32> -> vector<8x128xf32>
    %c3 = arith.constant 3 : index
    %c0_90 = arith.constant 0 : index
    %c0_91 = arith.constant 0 : index
    %179 = vector.load %arg12[%c3, %c0_90, %c0_91] : memref<8x8x128xf32, #tpu.memory_space<vmem>>, vector<1x8x128xf32>
    %180 = vector.shape_cast %179 : vector<1x8x128xf32> to vector<8x128xf32>
    %181 = arith.addf %180, %178 : vector<8x128xf32>
    %182 = arith.mulf %181, %8 : vector<8x128xf32>
    %183 = arith.negf %182 : vector<8x128xf32>
    %184 = math.exp %183 : vector<8x128xf32>
    %cst_92 = arith.constant 1.000000e+00 : f32
    %185 = vector.broadcast %cst_92 : f32 to vector<8x128xf32>
    %186 = arith.addf %185, %184 : vector<8x128xf32>
    %187 = arith.divf %185, %186 : vector<8x128xf32>
    %188 = arith.mulf %187, %8 : vector<8x128xf32>
    %189 = arith.addf %188, %11 : vector<8x128xf32>
    %190 = vector.extract_strided_slice %189 {offsets = [0, 0], sizes = [8, 32], strides = [1, 1]} : vector<8x128xf32> to vector<8x32xf32>
    %191 = vector.extract_strided_slice %189 {offsets = [0, 32], sizes = [8, 32], strides = [1, 1]} : vector<8x128xf32> to vector<8x32xf32>
    %192 = vector.extract_strided_slice %189 {offsets = [0, 64], sizes = [8, 32], strides = [1, 1]} : vector<8x128xf32> to vector<8x32xf32>
    %193 = vector.extract_strided_slice %189 {offsets = [0, 96], sizes = [8, 32], strides = [1, 1]} : vector<8x128xf32> to vector<8x32xf32>
    %194 = arith.mulf %191, %148 : vector<8x32xf32>
    %195 = arith.mulf %190, %192 : vector<8x32xf32>
    %196 = arith.addf %194, %195 : vector<8x32xf32>
    %197 = math.tanh %196 : vector<8x32xf32>
    %198 = arith.mulf %193, %197 : vector<8x32xf32>
    %c0_93 = arith.constant 0 : index
    %c0_94 = arith.constant 0 : index
    %199 = vector.load %arg14[%c0_93, %c0_94] : memref<8x64xf32, #tpu.memory_space<vmem>>, vector<8x32xf32>
    tpu.vector_store %arg14[%c0_93, %c0_94], %198 {strides = array<i32>} : memref<8x64xf32, #tpu.memory_space<vmem>>, vector<8x32xf32>,
    %c0_95 = arith.constant 0 : index
    %c0_96 = arith.constant 0 : index
    %200 = vector.load %arg14[%c0_95, %c0_96] : memref<8x64xf32, #tpu.memory_space<vmem>>, vector<8x64xf32>
    %c0_97 = arith.constant 0 : index
    %c0_98 = arith.constant 0 : index
    %201 = vector.load %arg6[%c0_97, %c0_98] : memref<64x128xf32, #tpu.memory_space<vmem>>, vector<64x128xf32>
    %cst_99 = arith.constant dense<0.000000e+00> : vector<8x128xf32>
    %202 = tpu.matmul %200, %201, %cst_99 {dimension_numbers = #tpu.dot_dimension_numbers<[1], [0], [0], [1], [0, 0, 1, 1], [], []>} : vector<8x64xf32>, vector<64x128xf32>, vector<8x128xf32> -> vector<8x128xf32>
    %203 = arith.addf %202, %14 : vector<8x128xf32>
    %204 = arith.mulf %203, %8 : vector<8x128xf32>
    %205 = arith.negf %204 : vector<8x128xf32>
    %206 = math.exp %205 : vector<8x128xf32>
    %cst_100 = arith.constant 1.000000e+00 : f32
    %207 = vector.broadcast %cst_100 : f32 to vector<8x128xf32>
    %208 = arith.addf %207, %206 : vector<8x128xf32>
    %209 = arith.divf %207, %208 : vector<8x128xf32>
    %210 = arith.mulf %209, %8 : vector<8x128xf32>
    %211 = arith.addf %210, %11 : vector<8x128xf32>
    %212 = vector.extract_strided_slice %211 {offsets = [0, 0], sizes = [8, 32], strides = [1, 1]} : vector<8x128xf32> to vector<8x32xf32>
    %213 = vector.extract_strided_slice %211 {offsets = [0, 32], sizes = [8, 32], strides = [1, 1]} : vector<8x128xf32> to vector<8x32xf32>
    %214 = vector.extract_strided_slice %211 {offsets = [0, 64], sizes = [8, 32], strides = [1, 1]} : vector<8x128xf32> to vector<8x32xf32>
    %215 = vector.extract_strided_slice %211 {offsets = [0, 96], sizes = [8, 32], strides = [1, 1]} : vector<8x128xf32> to vector<8x32xf32>
    %216 = arith.mulf %213, %170 : vector<8x32xf32>
    %217 = arith.mulf %212, %214 : vector<8x32xf32>
    %218 = arith.addf %216, %217 : vector<8x32xf32>
    %219 = math.tanh %218 : vector<8x32xf32>
    %220 = arith.mulf %215, %219 : vector<8x32xf32>
    %c0_101 = arith.constant 0 : index
    %c32_102 = arith.constant 32 : index
    %221 = vector.load %arg14[%c0_101, %c32_102] : memref<8x64xf32, #tpu.memory_space<vmem>>, vector<8x32xf32>
    tpu.vector_store %arg14[%c0_101, %c32_102], %220 {strides = array<i32>} : memref<8x64xf32, #tpu.memory_space<vmem>>, vector<8x32xf32>,
    %c3_103 = arith.constant 3 : index
    %c0_104 = arith.constant 0 : index
    %c0_105 = arith.constant 0 : index
    %222 = vector.load %arg13[%c3_103, %c0_104, %c0_105] : memref<8x8x32xf32, #tpu.memory_space<vmem>>, vector<1x8x32xf32>
    %223 = vector.shape_cast %222 : vector<1x8x32xf32> to vector<8x32xf32>
    %224 = vector.shape_cast %220 : vector<8x32xf32> to vector<1x8x32xf32>
    tpu.vector_store %arg13[%c3_103, %c0_104, %c0_105], %224 {strides = array<i32>} : memref<8x8x32xf32, #tpu.memory_space<vmem>>, vector<1x8x32xf32>,
    %c0_106 = arith.constant 0 : index
    %c0_107 = arith.constant 0 : index
    %225 = vector.load %arg5[%c0_106, %c0_107] : memref<32x128xf32, #tpu.memory_space<vmem>>, vector<32x128xf32>
    %cst_108 = arith.constant dense<0.000000e+00> : vector<8x128xf32>
    %226 = tpu.matmul %198, %225, %cst_108 {dimension_numbers = #tpu.dot_dimension_numbers<[1], [0], [0], [1], [0, 0, 1, 1], [], []>} : vector<8x32xf32>, vector<32x128xf32>, vector<8x128xf32> -> vector<8x128xf32>
    %c4 = arith.constant 4 : index
    %c0_109 = arith.constant 0 : index
    %c0_110 = arith.constant 0 : index
    %227 = vector.load %arg12[%c4, %c0_109, %c0_110] : memref<8x8x128xf32, #tpu.memory_space<vmem>>, vector<1x8x128xf32>
    %228 = vector.shape_cast %227 : vector<1x8x128xf32> to vector<8x128xf32>
    %229 = arith.addf %228, %226 : vector<8x128xf32>
    %230 = arith.mulf %229, %8 : vector<8x128xf32>
    %231 = arith.negf %230 : vector<8x128xf32>
    %232 = math.exp %231 : vector<8x128xf32>
    %cst_111 = arith.constant 1.000000e+00 : f32
    %233 = vector.broadcast %cst_111 : f32 to vector<8x128xf32>
    %234 = arith.addf %233, %232 : vector<8x128xf32>
    %235 = arith.divf %233, %234 : vector<8x128xf32>
    %236 = arith.mulf %235, %8 : vector<8x128xf32>
    %237 = arith.addf %236, %11 : vector<8x128xf32>
    %238 = vector.extract_strided_slice %237 {offsets = [0, 0], sizes = [8, 32], strides = [1, 1]} : vector<8x128xf32> to vector<8x32xf32>
    %239 = vector.extract_strided_slice %237 {offsets = [0, 32], sizes = [8, 32], strides = [1, 1]} : vector<8x128xf32> to vector<8x32xf32>
    %240 = vector.extract_strided_slice %237 {offsets = [0, 64], sizes = [8, 32], strides = [1, 1]} : vector<8x128xf32> to vector<8x32xf32>
    %241 = vector.extract_strided_slice %237 {offsets = [0, 96], sizes = [8, 32], strides = [1, 1]} : vector<8x128xf32> to vector<8x32xf32>
    %242 = arith.mulf %239, %196 : vector<8x32xf32>
    %243 = arith.mulf %238, %240 : vector<8x32xf32>
    %244 = arith.addf %242, %243 : vector<8x32xf32>
    %245 = math.tanh %244 : vector<8x32xf32>
    %246 = arith.mulf %241, %245 : vector<8x32xf32>
    %c0_112 = arith.constant 0 : index
    %c0_113 = arith.constant 0 : index
    %247 = vector.load %arg14[%c0_112, %c0_113] : memref<8x64xf32, #tpu.memory_space<vmem>>, vector<8x32xf32>
    tpu.vector_store %arg14[%c0_112, %c0_113], %246 {strides = array<i32>} : memref<8x64xf32, #tpu.memory_space<vmem>>, vector<8x32xf32>,
    %c0_114 = arith.constant 0 : index
    %c0_115 = arith.constant 0 : index
    %248 = vector.load %arg14[%c0_114, %c0_115] : memref<8x64xf32, #tpu.memory_space<vmem>>, vector<8x64xf32>
    %c0_116 = arith.constant 0 : index
    %c0_117 = arith.constant 0 : index
    %249 = vector.load %arg6[%c0_116, %c0_117] : memref<64x128xf32, #tpu.memory_space<vmem>>, vector<64x128xf32>
    %cst_118 = arith.constant dense<0.000000e+00> : vector<8x128xf32>
    %250 = tpu.matmul %248, %249, %cst_118 {dimension_numbers = #tpu.dot_dimension_numbers<[1], [0], [0], [1], [0, 0, 1, 1], [], []>} : vector<8x64xf32>, vector<64x128xf32>, vector<8x128xf32> -> vector<8x128xf32>
    %251 = arith.addf %250, %14 : vector<8x128xf32>
    %252 = arith.mulf %251, %8 : vector<8x128xf32>
    %253 = arith.negf %252 : vector<8x128xf32>
    %254 = math.exp %253 : vector<8x128xf32>
    %cst_119 = arith.constant 1.000000e+00 : f32
    %255 = vector.broadcast %cst_119 : f32 to vector<8x128xf32>
    %256 = arith.addf %255, %254 : vector<8x128xf32>
    %257 = arith.divf %255, %256 : vector<8x128xf32>
    %258 = arith.mulf %257, %8 : vector<8x128xf32>
    %259 = arith.addf %258, %11 : vector<8x128xf32>
    %260 = vector.extract_strided_slice %259 {offsets = [0, 0], sizes = [8, 32], strides = [1, 1]} : vector<8x128xf32> to vector<8x32xf32>
    %261 = vector.extract_strided_slice %259 {offsets = [0, 32], sizes = [8, 32], strides = [1, 1]} : vector<8x128xf32> to vector<8x32xf32>
    %262 = vector.extract_strided_slice %259 {offsets = [0, 64], sizes = [8, 32], strides = [1, 1]} : vector<8x128xf32> to vector<8x32xf32>
    %263 = vector.extract_strided_slice %259 {offsets = [0, 96], sizes = [8, 32], strides = [1, 1]} : vector<8x128xf32> to vector<8x32xf32>
    %264 = arith.mulf %261, %218 : vector<8x32xf32>
    %265 = arith.mulf %260, %262 : vector<8x32xf32>
    %266 = arith.addf %264, %265 : vector<8x32xf32>
    %267 = math.tanh %266 : vector<8x32xf32>
    %268 = arith.mulf %263, %267 : vector<8x32xf32>
    %c0_120 = arith.constant 0 : index
    %c32_121 = arith.constant 32 : index
    %269 = vector.load %arg14[%c0_120, %c32_121] : memref<8x64xf32, #tpu.memory_space<vmem>>, vector<8x32xf32>
    tpu.vector_store %arg14[%c0_120, %c32_121], %268 {strides = array<i32>} : memref<8x64xf32, #tpu.memory_space<vmem>>, vector<8x32xf32>,
    %c4_122 = arith.constant 4 : index
    %c0_123 = arith.constant 0 : index
    %c0_124 = arith.constant 0 : index
    %270 = vector.load %arg13[%c4_122, %c0_123, %c0_124] : memref<8x8x32xf32, #tpu.memory_space<vmem>>, vector<1x8x32xf32>
    %271 = vector.shape_cast %270 : vector<1x8x32xf32> to vector<8x32xf32>
    %272 = vector.shape_cast %268 : vector<8x32xf32> to vector<1x8x32xf32>
    tpu.vector_store %arg13[%c4_122, %c0_123, %c0_124], %272 {strides = array<i32>} : memref<8x8x32xf32, #tpu.memory_space<vmem>>, vector<1x8x32xf32>,
    %c0_125 = arith.constant 0 : index
    %c0_126 = arith.constant 0 : index
    %273 = vector.load %arg5[%c0_125, %c0_126] : memref<32x128xf32, #tpu.memory_space<vmem>>, vector<32x128xf32>
    %cst_127 = arith.constant dense<0.000000e+00> : vector<8x128xf32>
    %274 = tpu.matmul %246, %273, %cst_127 {dimension_numbers = #tpu.dot_dimension_numbers<[1], [0], [0], [1], [0, 0, 1, 1], [], []>} : vector<8x32xf32>, vector<32x128xf32>, vector<8x128xf32> -> vector<8x128xf32>
    %c5 = arith.constant 5 : index
    %c0_128 = arith.constant 0 : index
    %c0_129 = arith.constant 0 : index
    %275 = vector.load %arg12[%c5, %c0_128, %c0_129] : memref<8x8x128xf32, #tpu.memory_space<vmem>>, vector<1x8x128xf32>
    %276 = vector.shape_cast %275 : vector<1x8x128xf32> to vector<8x128xf32>
    %277 = arith.addf %276, %274 : vector<8x128xf32>
    %278 = arith.mulf %277, %8 : vector<8x128xf32>
    %279 = arith.negf %278 : vector<8x128xf32>
    %280 = math.exp %279 : vector<8x128xf32>
    %cst_130 = arith.constant 1.000000e+00 : f32
    %281 = vector.broadcast %cst_130 : f32 to vector<8x128xf32>
    %282 = arith.addf %281, %280 : vector<8x128xf32>
    %283 = arith.divf %281, %282 : vector<8x128xf32>
    %284 = arith.mulf %283, %8 : vector<8x128xf32>
    %285 = arith.addf %284, %11 : vector<8x128xf32>
    %286 = vector.extract_strided_slice %285 {offsets = [0, 0], sizes = [8, 32], strides = [1, 1]} : vector<8x128xf32> to vector<8x32xf32>
    %287 = vector.extract_strided_slice %285 {offsets = [0, 32], sizes = [8, 32], strides = [1, 1]} : vector<8x128xf32> to vector<8x32xf32>
    %288 = vector.extract_strided_slice %285 {offsets = [0, 64], sizes = [8, 32], strides = [1, 1]} : vector<8x128xf32> to vector<8x32xf32>
    %289 = vector.extract_strided_slice %285 {offsets = [0, 96], sizes = [8, 32], strides = [1, 1]} : vector<8x128xf32> to vector<8x32xf32>
    %290 = arith.mulf %287, %244 : vector<8x32xf32>
    %291 = arith.mulf %286, %288 : vector<8x32xf32>
    %292 = arith.addf %290, %291 : vector<8x32xf32>
    %293 = math.tanh %292 : vector<8x32xf32>
    %294 = arith.mulf %289, %293 : vector<8x32xf32>
    %c0_131 = arith.constant 0 : index
    %c0_132 = arith.constant 0 : index
    %295 = vector.load %arg14[%c0_131, %c0_132] : memref<8x64xf32, #tpu.memory_space<vmem>>, vector<8x32xf32>
    tpu.vector_store %arg14[%c0_131, %c0_132], %294 {strides = array<i32>} : memref<8x64xf32, #tpu.memory_space<vmem>>, vector<8x32xf32>,
    %c0_133 = arith.constant 0 : index
    %c0_134 = arith.constant 0 : index
    %296 = vector.load %arg14[%c0_133, %c0_134] : memref<8x64xf32, #tpu.memory_space<vmem>>, vector<8x64xf32>
    %c0_135 = arith.constant 0 : index
    %c0_136 = arith.constant 0 : index
    %297 = vector.load %arg6[%c0_135, %c0_136] : memref<64x128xf32, #tpu.memory_space<vmem>>, vector<64x128xf32>
    %cst_137 = arith.constant dense<0.000000e+00> : vector<8x128xf32>
    %298 = tpu.matmul %296, %297, %cst_137 {dimension_numbers = #tpu.dot_dimension_numbers<[1], [0], [0], [1], [0, 0, 1, 1], [], []>} : vector<8x64xf32>, vector<64x128xf32>, vector<8x128xf32> -> vector<8x128xf32>
    %299 = arith.addf %298, %14 : vector<8x128xf32>
    %300 = arith.mulf %299, %8 : vector<8x128xf32>
    %301 = arith.negf %300 : vector<8x128xf32>
    %302 = math.exp %301 : vector<8x128xf32>
    %cst_138 = arith.constant 1.000000e+00 : f32
    %303 = vector.broadcast %cst_138 : f32 to vector<8x128xf32>
    %304 = arith.addf %303, %302 : vector<8x128xf32>
    %305 = arith.divf %303, %304 : vector<8x128xf32>
    %306 = arith.mulf %305, %8 : vector<8x128xf32>
    %307 = arith.addf %306, %11 : vector<8x128xf32>
    %308 = vector.extract_strided_slice %307 {offsets = [0, 0], sizes = [8, 32], strides = [1, 1]} : vector<8x128xf32> to vector<8x32xf32>
    %309 = vector.extract_strided_slice %307 {offsets = [0, 32], sizes = [8, 32], strides = [1, 1]} : vector<8x128xf32> to vector<8x32xf32>
    %310 = vector.extract_strided_slice %307 {offsets = [0, 64], sizes = [8, 32], strides = [1, 1]} : vector<8x128xf32> to vector<8x32xf32>
    %311 = vector.extract_strided_slice %307 {offsets = [0, 96], sizes = [8, 32], strides = [1, 1]} : vector<8x128xf32> to vector<8x32xf32>
    %312 = arith.mulf %309, %266 : vector<8x32xf32>
    %313 = arith.mulf %308, %310 : vector<8x32xf32>
    %314 = arith.addf %312, %313 : vector<8x32xf32>
    %315 = math.tanh %314 : vector<8x32xf32>
    %316 = arith.mulf %311, %315 : vector<8x32xf32>
    %c0_139 = arith.constant 0 : index
    %c32_140 = arith.constant 32 : index
    %317 = vector.load %arg14[%c0_139, %c32_140] : memref<8x64xf32, #tpu.memory_space<vmem>>, vector<8x32xf32>
    tpu.vector_store %arg14[%c0_139, %c32_140], %316 {strides = array<i32>} : memref<8x64xf32, #tpu.memory_space<vmem>>, vector<8x32xf32>,
    %c5_141 = arith.constant 5 : index
    %c0_142 = arith.constant 0 : index
    %c0_143 = arith.constant 0 : index
    %318 = vector.load %arg13[%c5_141, %c0_142, %c0_143] : memref<8x8x32xf32, #tpu.memory_space<vmem>>, vector<1x8x32xf32>
    %319 = vector.shape_cast %318 : vector<1x8x32xf32> to vector<8x32xf32>
    %320 = vector.shape_cast %316 : vector<8x32xf32> to vector<1x8x32xf32>
    tpu.vector_store %arg13[%c5_141, %c0_142, %c0_143], %320 {strides = array<i32>} : memref<8x8x32xf32, #tpu.memory_space<vmem>>, vector<1x8x32xf32>,
    %c0_144 = arith.constant 0 : index
    %c0_145 = arith.constant 0 : index
    %321 = vector.load %arg5[%c0_144, %c0_145] : memref<32x128xf32, #tpu.memory_space<vmem>>, vector<32x128xf32>
    %cst_146 = arith.constant dense<0.000000e+00> : vector<8x128xf32>
    %322 = tpu.matmul %294, %321, %cst_146 {dimension_numbers = #tpu.dot_dimension_numbers<[1], [0], [0], [1], [0, 0, 1, 1], [], []>} : vector<8x32xf32>, vector<32x128xf32>, vector<8x128xf32> -> vector<8x128xf32>
    %c6 = arith.constant 6 : index
    %c0_147 = arith.constant 0 : index
    %c0_148 = arith.constant 0 : index
    %323 = vector.load %arg12[%c6, %c0_147, %c0_148] : memref<8x8x128xf32, #tpu.memory_space<vmem>>, vector<1x8x128xf32>
    %324 = vector.shape_cast %323 : vector<1x8x128xf32> to vector<8x128xf32>
    %325 = arith.addf %324, %322 : vector<8x128xf32>
    %326 = arith.mulf %325, %8 : vector<8x128xf32>
    %327 = arith.negf %326 : vector<8x128xf32>
    %328 = math.exp %327 : vector<8x128xf32>
    %cst_149 = arith.constant 1.000000e+00 : f32
    %329 = vector.broadcast %cst_149 : f32 to vector<8x128xf32>
    %330 = arith.addf %329, %328 : vector<8x128xf32>
    %331 = arith.divf %329, %330 : vector<8x128xf32>
    %332 = arith.mulf %331, %8 : vector<8x128xf32>
    %333 = arith.addf %332, %11 : vector<8x128xf32>
    %334 = vector.extract_strided_slice %333 {offsets = [0, 0], sizes = [8, 32], strides = [1, 1]} : vector<8x128xf32> to vector<8x32xf32>
    %335 = vector.extract_strided_slice %333 {offsets = [0, 32], sizes = [8, 32], strides = [1, 1]} : vector<8x128xf32> to vector<8x32xf32>
    %336 = vector.extract_strided_slice %333 {offsets = [0, 64], sizes = [8, 32], strides = [1, 1]} : vector<8x128xf32> to vector<8x32xf32>
    %337 = vector.extract_strided_slice %333 {offsets = [0, 96], sizes = [8, 32], strides = [1, 1]} : vector<8x128xf32> to vector<8x32xf32>
    %338 = arith.mulf %335, %292 : vector<8x32xf32>
    %339 = arith.mulf %334, %336 : vector<8x32xf32>
    %340 = arith.addf %338, %339 : vector<8x32xf32>
    %341 = math.tanh %340 : vector<8x32xf32>
    %342 = arith.mulf %337, %341 : vector<8x32xf32>
    %c0_150 = arith.constant 0 : index
    %c0_151 = arith.constant 0 : index
    %343 = vector.load %arg14[%c0_150, %c0_151] : memref<8x64xf32, #tpu.memory_space<vmem>>, vector<8x32xf32>
    tpu.vector_store %arg14[%c0_150, %c0_151], %342 {strides = array<i32>} : memref<8x64xf32, #tpu.memory_space<vmem>>, vector<8x32xf32>,
    %c0_152 = arith.constant 0 : index
    %c0_153 = arith.constant 0 : index
    %344 = vector.load %arg14[%c0_152, %c0_153] : memref<8x64xf32, #tpu.memory_space<vmem>>, vector<8x64xf32>
    %c0_154 = arith.constant 0 : index
    %c0_155 = arith.constant 0 : index
    %345 = vector.load %arg6[%c0_154, %c0_155] : memref<64x128xf32, #tpu.memory_space<vmem>>, vector<64x128xf32>
    %cst_156 = arith.constant dense<0.000000e+00> : vector<8x128xf32>
    %346 = tpu.matmul %344, %345, %cst_156 {dimension_numbers = #tpu.dot_dimension_numbers<[1], [0], [0], [1], [0, 0, 1, 1], [], []>} : vector<8x64xf32>, vector<64x128xf32>, vector<8x128xf32> -> vector<8x128xf32>
    %347 = arith.addf %346, %14 : vector<8x128xf32>
    %348 = arith.mulf %347, %8 : vector<8x128xf32>
    %349 = arith.negf %348 : vector<8x128xf32>
    %350 = math.exp %349 : vector<8x128xf32>
    %cst_157 = arith.constant 1.000000e+00 : f32
    %351 = vector.broadcast %cst_157 : f32 to vector<8x128xf32>
    %352 = arith.addf %351, %350 : vector<8x128xf32>
    %353 = arith.divf %351, %352 : vector<8x128xf32>
    %354 = arith.mulf %353, %8 : vector<8x128xf32>
    %355 = arith.addf %354, %11 : vector<8x128xf32>
    %356 = vector.extract_strided_slice %355 {offsets = [0, 0], sizes = [8, 32], strides = [1, 1]} : vector<8x128xf32> to vector<8x32xf32>
    %357 = vector.extract_strided_slice %355 {offsets = [0, 32], sizes = [8, 32], strides = [1, 1]} : vector<8x128xf32> to vector<8x32xf32>
    %358 = vector.extract_strided_slice %355 {offsets = [0, 64], sizes = [8, 32], strides = [1, 1]} : vector<8x128xf32> to vector<8x32xf32>
    %359 = vector.extract_strided_slice %355 {offsets = [0, 96], sizes = [8, 32], strides = [1, 1]} : vector<8x128xf32> to vector<8x32xf32>
    %360 = arith.mulf %357, %314 : vector<8x32xf32>
    %361 = arith.mulf %356, %358 : vector<8x32xf32>
    %362 = arith.addf %360, %361 : vector<8x32xf32>
    %363 = math.tanh %362 : vector<8x32xf32>
    %364 = arith.mulf %359, %363 : vector<8x32xf32>
    %c0_158 = arith.constant 0 : index
    %c32_159 = arith.constant 32 : index
    %365 = vector.load %arg14[%c0_158, %c32_159] : memref<8x64xf32, #tpu.memory_space<vmem>>, vector<8x32xf32>
    tpu.vector_store %arg14[%c0_158, %c32_159], %364 {strides = array<i32>} : memref<8x64xf32, #tpu.memory_space<vmem>>, vector<8x32xf32>,
    %c6_160 = arith.constant 6 : index
    %c0_161 = arith.constant 0 : index
    %c0_162 = arith.constant 0 : index
    %366 = vector.load %arg13[%c6_160, %c0_161, %c0_162] : memref<8x8x32xf32, #tpu.memory_space<vmem>>, vector<1x8x32xf32>
    %367 = vector.shape_cast %366 : vector<1x8x32xf32> to vector<8x32xf32>
    %368 = vector.shape_cast %364 : vector<8x32xf32> to vector<1x8x32xf32>
    tpu.vector_store %arg13[%c6_160, %c0_161, %c0_162], %368 {strides = array<i32>} : memref<8x8x32xf32, #tpu.memory_space<vmem>>, vector<1x8x32xf32>,
    %c0_163 = arith.constant 0 : index
    %c0_164 = arith.constant 0 : index
    %369 = vector.load %arg5[%c0_163, %c0_164] : memref<32x128xf32, #tpu.memory_space<vmem>>, vector<32x128xf32>
    %cst_165 = arith.constant dense<0.000000e+00> : vector<8x128xf32>
    %370 = tpu.matmul %342, %369, %cst_165 {dimension_numbers = #tpu.dot_dimension_numbers<[1], [0], [0], [1], [0, 0, 1, 1], [], []>} : vector<8x32xf32>, vector<32x128xf32>, vector<8x128xf32> -> vector<8x128xf32>
    %c7 = arith.constant 7 : index
    %c0_166 = arith.constant 0 : index
    %c0_167 = arith.constant 0 : index
    %371 = vector.load %arg12[%c7, %c0_166, %c0_167] : memref<8x8x128xf32, #tpu.memory_space<vmem>>, vector<1x8x128xf32>
    %372 = vector.shape_cast %371 : vector<1x8x128xf32> to vector<8x128xf32>
    %373 = arith.addf %372, %370 : vector<8x128xf32>
    %374 = arith.mulf %373, %8 : vector<8x128xf32>
    %375 = arith.negf %374 : vector<8x128xf32>
    %376 = math.exp %375 : vector<8x128xf32>
    %cst_168 = arith.constant 1.000000e+00 : f32
    %377 = vector.broadcast %cst_168 : f32 to vector<8x128xf32>
    %378 = arith.addf %377, %376 : vector<8x128xf32>
    %379 = arith.divf %377, %378 : vector<8x128xf32>
    %380 = arith.mulf %379, %8 : vector<8x128xf32>
    %381 = arith.addf %380, %11 : vector<8x128xf32>
    %382 = vector.extract_strided_slice %381 {offsets = [0, 0], sizes = [8, 32], strides = [1, 1]} : vector<8x128xf32> to vector<8x32xf32>
    %383 = vector.extract_strided_slice %381 {offsets = [0, 32], sizes = [8, 32], strides = [1, 1]} : vector<8x128xf32> to vector<8x32xf32>
    %384 = vector.extract_strided_slice %381 {offsets = [0, 64], sizes = [8, 32], strides = [1, 1]} : vector<8x128xf32> to vector<8x32xf32>
    %385 = vector.extract_strided_slice %381 {offsets = [0, 96], sizes = [8, 32], strides = [1, 1]} : vector<8x128xf32> to vector<8x32xf32>
    %386 = arith.mulf %383, %340 : vector<8x32xf32>
    %387 = arith.mulf %382, %384 : vector<8x32xf32>
    %388 = arith.addf %386, %387 : vector<8x32xf32>
    %389 = math.tanh %388 : vector<8x32xf32>
    %390 = arith.mulf %385, %389 : vector<8x32xf32>
    %c0_169 = arith.constant 0 : index
    %c0_170 = arith.constant 0 : index
    %391 = vector.load %arg14[%c0_169, %c0_170] : memref<8x64xf32, #tpu.memory_space<vmem>>, vector<8x32xf32>
    tpu.vector_store %arg14[%c0_169, %c0_170], %390 {strides = array<i32>} : memref<8x64xf32, #tpu.memory_space<vmem>>, vector<8x32xf32>,
    %c0_171 = arith.constant 0 : index
    %c0_172 = arith.constant 0 : index
    %392 = vector.load %arg14[%c0_171, %c0_172] : memref<8x64xf32, #tpu.memory_space<vmem>>, vector<8x64xf32>
    %c0_173 = arith.constant 0 : index
    %c0_174 = arith.constant 0 : index
    %393 = vector.load %arg6[%c0_173, %c0_174] : memref<64x128xf32, #tpu.memory_space<vmem>>, vector<64x128xf32>
    %cst_175 = arith.constant dense<0.000000e+00> : vector<8x128xf32>
    %394 = tpu.matmul %392, %393, %cst_175 {dimension_numbers = #tpu.dot_dimension_numbers<[1], [0], [0], [1], [0, 0, 1, 1], [], []>} : vector<8x64xf32>, vector<64x128xf32>, vector<8x128xf32> -> vector<8x128xf32>
    %395 = arith.addf %394, %14 : vector<8x128xf32>
    %396 = arith.mulf %395, %8 : vector<8x128xf32>
    %397 = arith.negf %396 : vector<8x128xf32>
    %398 = math.exp %397 : vector<8x128xf32>
    %cst_176 = arith.constant 1.000000e+00 : f32
    %399 = vector.broadcast %cst_176 : f32 to vector<8x128xf32>
    %400 = arith.addf %399, %398 : vector<8x128xf32>
    %401 = arith.divf %399, %400 : vector<8x128xf32>
    %402 = arith.mulf %401, %8 : vector<8x128xf32>
    %403 = arith.addf %402, %11 : vector<8x128xf32>
    %404 = vector.extract_strided_slice %403 {offsets = [0, 0], sizes = [8, 32], strides = [1, 1]} : vector<8x128xf32> to vector<8x32xf32>
    %405 = vector.extract_strided_slice %403 {offsets = [0, 32], sizes = [8, 32], strides = [1, 1]} : vector<8x128xf32> to vector<8x32xf32>
    %406 = vector.extract_strided_slice %403 {offsets = [0, 64], sizes = [8, 32], strides = [1, 1]} : vector<8x128xf32> to vector<8x32xf32>
    %407 = vector.extract_strided_slice %403 {offsets = [0, 96], sizes = [8, 32], strides = [1, 1]} : vector<8x128xf32> to vector<8x32xf32>
    %408 = arith.mulf %405, %362 : vector<8x32xf32>
    %409 = arith.mulf %404, %406 : vector<8x32xf32>
    %410 = arith.addf %408, %409 : vector<8x32xf32>
    %411 = math.tanh %410 : vector<8x32xf32>
    %412 = arith.mulf %407, %411 : vector<8x32xf32>
    %c0_177 = arith.constant 0 : index
    %c32_178 = arith.constant 32 : index
    %413 = vector.load %arg14[%c0_177, %c32_178] : memref<8x64xf32, #tpu.memory_space<vmem>>, vector<8x32xf32>
    tpu.vector_store %arg14[%c0_177, %c32_178], %412 {strides = array<i32>} : memref<8x64xf32, #tpu.memory_space<vmem>>, vector<8x32xf32>,
    %c7_179 = arith.constant 7 : index
    %c0_180 = arith.constant 0 : index
    %c0_181 = arith.constant 0 : index
    %414 = vector.load %arg13[%c7_179, %c0_180, %c0_181] : memref<8x8x32xf32, #tpu.memory_space<vmem>>, vector<1x8x32xf32>
    %415 = vector.shape_cast %414 : vector<1x8x32xf32> to vector<8x32xf32>
    %416 = vector.shape_cast %412 : vector<8x32xf32> to vector<1x8x32xf32>
    tpu.vector_store %arg13[%c7_179, %c0_180, %c0_181], %416 {strides = array<i32>} : memref<8x8x32xf32, #tpu.memory_space<vmem>>, vector<1x8x32xf32>,
    %c0_182 = arith.constant 0 : index
    %c0_183 = arith.constant 0 : index
    %c0_184 = arith.constant 0 : index
    %417 = vector.load %arg13[%c0_182, %c0_183, %c0_184] : memref<8x8x32xf32, #tpu.memory_space<vmem>>, vector<8x8x32xf32>
    %c0_185 = arith.constant 0 : index
    %c0_186 = arith.constant 0 : index
    %c0_187 = arith.constant 0 : index
    %418 = vector.load %arg8[%c0_185, %c0_186, %c0_187] : memref<1x1x32xf32, #tpu.memory_space<vmem>>, vector<1x1x32xf32>
    %419 = vector.broadcast %418 : vector<1x1x32xf32> to vector<8x8x32xf32>
    %420 = arith.mulf %417, %419 : vector<8x8x32xf32>
    %cst_188 = arith.constant dense<0.000000e+00> : vector<8x8xf32>
    %421 = vector.multi_reduction <add>, %420, %cst_188 [2] : vector<8x8x32xf32> to vector<8x8xf32>
    %c0_189 = arith.constant 0 : index
    %c0_190 = arith.constant 0 : index
    %422 = vector.load %arg9[%c0_189, %c0_190] : memref<1x1xf32, #tpu.memory_space<vmem>>, vector<1x1xf32>
    %423 = vector.broadcast %422 : vector<1x1xf32> to vector<8x8xf32>
    %424 = arith.addf %421, %423 : vector<8x8xf32>
    %c0_191 = arith.constant 0 : index
    %c0_192 = arith.constant 0 : index
    %425 = vector.load %arg10[%c0_191, %c0_192] : memref<8x8xf32, #tpu.memory_space<vmem>>, vector<8x8xf32>
    tpu.vector_store %arg10[%c0_191, %c0_192], %424 {strides = array<i32>} : memref<8x8xf32, #tpu.memory_space<vmem>>, vector<8x8xf32>,
    %426 = tpu.concatenate %390, %412, %388, %410 in 1 : vector<8x32xf32>, vector<8x32xf32>, vector<8x32xf32>, vector<8x32xf32> -> vector<8x128xf32>
    %c0_193 = arith.constant 0 : index
    %c0_194 = arith.constant 0 : index
    %427 = vector.load %arg11[%c0_193, %c0_194] : memref<8x128xf32, #tpu.memory_space<vmem>>, vector<8x128xf32>
    tpu.vector_store %arg11[%c0_193, %c0_194], %426 {strides = array<i32>} : memref<8x128xf32, #tpu.memory_space<vmem>>, vector<8x128xf32>,
    return
  }
}

</mosaic_0001>

<bundles_post_ra>
// kernel: tpu_custom_call.1
= control target key start
LH: loop header
LB: loop body
LE: loop exit
PB: predicated region body
PF: predicated region fallthrough
CT: control target
= control target key end

     0   :  { %s3485_s0 = inlined_call_operand.vmem [shape: f32[8,8,1], index: 0, kind: input, shape index: {}]   ;;  %s3486_s1 = inlined_call_operand.vmem [shape: f32[2,8,32], index: 1, kind: input, shape index: {}]   ;;  %s3487_s2 = inlined_call_operand.hbm [shape: f32[2,8,32], index: 2, kind: input, shape index: {}]   ;;  %s3488_s3 = inlined_call_operand.vmem [shape: f32[1,1,128], index: 3, kind: input, shape index: {}]   ;;  %s3489_s4 = inlined_call_operand.vmem [shape: f32[1,1,128], index: 4, kind: input, shape index: {}]   ;;  %s3490_s5 = inlined_call_operand.hbm [shape: f32[32,128], index: 5, kind: input, shape index: {}]   ;;  %s3491_s6 = inlined_call_operand.vmem [shape: f32[64,128], index: 6, kind: input, shape index: {}]   ;;  %s3492_s7 = inlined_call_operand.vmem [shape: f32[1,128], index: 7, kind: input, shape index: {}]   ;;  %s3493_s8 = inlined_call_operand.vmem [shape: f32[1,1,32], index: 8, kind: input, shape index: {}]   ;;  %s3494_s9 = inlined_call_operand.<no memory space> [shape: f32[1,1], index: 9, kind: input, shape index: {}]   ;;  %s3495_s10 = inlined_call_operand.hbm [shape: f32[8,8], index: 10, kind: output, shape index: {0}]   ;;  %s3496_s11 = inlined_call_operand.hbm [shape: f32[8,128], index: 11, kind: output, shape index: {1}]  }
   0x1   :  { %v17_v0 = vstv %s3494_s9 }
   0x2   :  { %18 = vst [vmem:[#allocation5] sm:$0x1] %v17_v0 }
   0x3   :  { %19 = vsyncpa [#allocation7], 0 }
   0x4   :  { %20 = vsyncpa [#allocation10], 0 }
   0x5   :  { %21 = vsyncpa [#allocation8], 0 }
   0x6   :  { %22 = vsyncpa [#allocation13], 0  ;;  %s2770_s19 = smov [#allocation6]  }
   0x7   :  { %s32_s20 = sshll.u32 %s2770_s19, 4  ;;  %s33_s20 = int_to_ptr.vmem [resolvable:$true] %s32_s20 }
   0x8   :  { %s2690_s21 = scalar_lea.vmem %s33_s20, 256  ;;  %p2695_p1 = scmp.lt.s32.totalorder %s33_s20, %s33_s20 }
   0x9   :  { %p2691_p0 = scmp.ne.s32.totalorder %s33_s20, %s2690_s21  ;;  %p2696_p2 = scmp.lt.s32.totalorder %s2690_s21, %s2690_s21 }
   0xb   :  { %p2697_p3 = por %p2696_p2, %p2695_p1 }
   0xd   :  { %p2698_p4 = pnand %p2697_p3, %p2691_p0 }
   0xf   :  { %2701 = shalt.err (!%p2698_p4)
}
  0x10   :  { %s2771_s22 = smov 128   ;;  %s2772_s23 = smov 8  }
  0x11   :  { %38 = dma.hbm_to_vmem [thread:$0]  %s3487_s2, 256, %s33_s20, [#allocation7], %s2771_s22, %s2771_s22, %s2772_s23  }
  0x12   :  { %s2773_s9 = smov [#allocation9]  }
  0x13   :  { %s48_s26 = sshll.u32 %s2773_s9, 4  ;;  %s49_s26 = int_to_ptr.vmem [resolvable:$true] %s48_s26 }
  0x14   :  { %s2710_s27 = scalar_lea.vmem %s49_s26, 512  ;;  %p2715_p6 = scmp.lt.s32.totalorder %s49_s26, %s49_s26 }
  0x15   :  { %p2711_p5 = scmp.ne.s32.totalorder %s49_s26, %s2710_s27  ;;  %p2716_p7 = scmp.lt.s32.totalorder %s2710_s27, %s2710_s27 }
  0x17   :  { %p2717_p8 = por %p2716_p7, %p2715_p6 }
  0x19   :  { %p2718_p9 = pnand %p2717_p8, %p2711_p5 }
  0x1b   :  { %2721 = shalt.err (!%p2718_p9)
}
  0x1c   :  { %54 = dma.hbm_to_vmem [thread:$0]  %s3490_s5, 512, %s49_s26, [#allocation10], %s2771_s22, %s2771_s22, %s2772_s23  }
  0x1d   :  { %2762 = dma.done.wait [#allocation7], 256  }
  0x1e   :  { %2763 = vsyncadd [#allocation7], 4294967040 }
  0x1f   :  { %2764 = dma.done.wait [#allocation10], 512  }
  0x20   :  { %2765 = vsyncadd [#allocation10], 4294966784  ;;  %v2774_v1 = vmov 0.0   ;;  %vm2775_vm0 = vmmov 0   ;;  %v2776_v2 = vmov 0   ;;  %v2857_v3 = vld [vmem:[#allocation9 + $0x18] sm:$0xff]  ;;  %v69_v10 = vlaneseq }
  0x21   :  { %2329 = vmatprep.subr.mxu1 %v2774_v1  ;;  %2337 = vmatprep.mubr.msk.f32.mxu1 %vm2775_vm0, %v2774_v1  ;;  %v2859_v4 = vld [vmem:[#allocation9 + $0x10] sm:$0xff]  ;;  %v83_v5 = vld [vmem:[%s3485_s0] sm:$0xff]  ;;  %s2777_s30 = smov 32   ;;  %vm185_vm1 = vcmask 261120   ;;  %v2778_v17 = vmov 1.0   ;;  %s2779_s18 = smov 64  }
  0x22   :  { %2581 = vset.pattern.permute.xlu0 %v2776_v2  ;;  %2359 = vmatprep.subr.mxu0 %v2774_v1  ;;  %v2867_v6 = vld [vmem:[#allocation9 + $0x8] sm:$0xff]  ;;  %v170_v7 = vld [vmem:[#allocation6] sm:$0xff]  ;;  %v2872_v8 = vld [vmem:[#allocation9] sm:$0xff]  ;;  %v2897_v13 = vand.u32 127, %v69_v10  ;;  %vm179_vm5 = vcmask 523520   ;;  %vm305_vm6 = vcmask 523264  }
  0x23   :  { %2367 = vmatprep.mubr.msk.f32.mxu0 %vm2775_vm0, %v2774_v1  ;;  %2582 = vset.pattern.permute.xlu1 %v2776_v2  ;;  %v169_v9 = vld [vmem:[%s3486_s1] sm:$0xff]  ;;  %v2182_v36 = vld [vmem:[%s3486_s1 + $0x8] sm:$0xff]  ;;  %v2928_v37 = vld [vmem:[%s3491_s6 + $0x38] sm:$0xff]  ;;  %vm2119_vm7 = vcmask 1041409   ;;  %vm2121_vm8 = vcmask 1042434   ;;  %vm2123_vm9 = vcmask 1043459  }
  0x24   :  { %2330 = vmatpush3.msra.mxu1 %v2857_v3  ;;  %2360 = vmatpush3.msra.mxu0 %v2857_v3  ;;  %v2894_v11 = vld [vmem:[%s3488_s3] ss:$0 sm:$0xff]  ;;  %vm71_vm2 = vcmp.ge.s32.totalorder %v2897_v13, 64  ;;  %vm72_vm3 = vcmp.lt.s32.totalorder %v2897_v13, 96  ;;  %v2933_v38 = vld [vmem:[%s3491_s6 + $0x30] sm:$0xff]  ;;  %v2940_v39 = vld [vmem:[%s3491_s6 + $0x28] sm:$0xff] }
  0x25   :  { %2331 = vmatprep.subr.mxu1 %v2774_v1  ;;  %94 = vperm.xlu0 %2581, %v83_v5   ;;  %v2905_v15 = vld [vmem:[%s3489_s4] ss:$0 sm:$0xff]  ;;  %vm73_vm4 = vmand %vm71_vm2, %vm72_vm3  ;;  %v2958_v43 = vld [vmem:[%s3491_s6 + $0x18] sm:$0xff]  ;;  %vm2125_vm10 = vcmask 1044484   ;;  %vm2127_vm11 = vcmask 1045509   ;;  %vm2129_vm12 = vcmask 1046534  }
  0x26   :  { %2332 = vmatpush3.msra.mxu1 %v2859_v4  ;;  %271 = vrot.lane.b32.xlu1 %v170_v7, %s2777_s30  ;;  %v2908_v18 = vsel %vm73_vm4, 2.0, %v2778_v17  ;;  %v2912_v27 = vsel %vm73_vm4, -1.0, %v2774_v1  ;;  %v2947_v40 = vld [vmem:[%s3491_s6 + $0x20] sm:$0xff]  ;;  %v2963_v44 = vld [vmem:[%s3491_s6 + $0x10] sm:$0xff]  ;;  %v2970_v45 = vld [vmem:[%s3491_s6 + $0x8] sm:$0xff]  ;;  %vm2131_vm13 = vcmask 1047559  }
  0x27   :  { %2333 = vmatprep.subr.mxu1 %v2774_v1  ;;  %2361 = vmatprep.subr.mxu0 %v2774_v1  ;;  %v2977_v46 = vld [vmem:[%s3491_s6] sm:$0xff]  ;;  %v84_v47 = vld [vmem:[%s3485_s0 + $0x8] sm:$0xff]  ;;  %vm2134_vm14 = vcmask 64512   ;;  %vm2146_vm15 = vcmask 785408  }
  0x28   :  { %2334 = vmatpush3.msra.mxu1 %v2867_v6  ;;  %2362 = vmatpush3.msra.mxu0 %v2859_v4  ;;  %v3024_v60 = vld [vmem:[%s3492_s7] ss:$0 sm:$0xff] }
  0x29   :  { %2335 = vmatprep.subr.mxu1 %v2774_v1  ;;  %2363 = vmatprep.subr.mxu0 %v2774_v1 }
  0x2a   :  { %2336 = vmatpush3.msra.mxu1 %v2872_v8  ;;  %2364 = vmatpush3.msra.mxu0 %v2867_v6 }
  0x2b   :  { %2338 = vmatmul.mubr.msk.f32.vlgmr.msra.gmra.mxu1 %vm185_vm1, %v169_v9  ;;  %2340 = vmatprep.subr.mxu1 %v2774_v1 }
  0x2c   :  { %2365 = vmatprep.subr.mxu0 %v2774_v1  ;;  %2356 = vmatprep.mubr.msk.f32.mxu1 %vm2775_vm0, %v2774_v1 }
  0x2d   :  { %2366 = vmatpush3.msra.mxu0 %v2872_v8  ;;  %2341 = vmatpush3.msra.mxu1 %v2928_v37 }
  0x2e   :  { %2370 = vmatprep.subr.mxu0 %v2774_v1  ;;  %2342 = vmatprep.subr.mxu1 %v2774_v1 }
  0x2f   :  { %2343 = vmatpush3.msra.mxu1 %v2933_v38 }
  0x30   :  { %2344 = vmatprep.subr.mxu1 %v2774_v1 }
  0x31   :  { %2345 = vmatpush3.msra.mxu1 %v2940_v39 }
  0x32   :  { %2346 = vmatprep.subr.mxu1 %v2774_v1 }
  0x33   :  { %2347 = vmatpush3.msra.mxu1 %v2947_v40 }
  0x34   :  { %2348 = vmatprep.subr.mxu1 %v2774_v1 }
  0x35   :  { %2349 = vmatpush3.msra.mxu1 %v2958_v43 }
  0x36   :  { %2350 = vmatprep.subr.mxu1 %v2774_v1 }
  0x37   :  { %2351 = vmatpush3.msra.mxu1 %v2963_v44 }
  0x38   :  { %2352 = vmatprep.subr.mxu1 %v2774_v1 }
  0x39   :  { %2353 = vmatpush3.msra.mxu1 %v2970_v45 }
  0x3a   :  { %2354 = vmatprep.subr.mxu1 %v2774_v1 }
  0x3b   :  { %2355 = vmatpush3.msra.mxu1 %v2977_v46 }
  0x3c   :  { %2389 = vmatprep.subr.mxu1 %v2774_v1 }
  0x98   :  { %v272_v32 = vpop.permute.xlu1 %271 }
  0xa0   :  { %v95_v12 = vpop.permute.xlu0 %94 }
  0xa1   :  { %v138_v14 = vmul.f32 %v2894_v11, %v95_v12 }
  0xa3   :  { %v153_v16 = vadd.f32 %v2905_v15, %v138_v14 }
  0xeb   :  { %v255_v19 = vpop.f32.mrf.mxu1 }
  0xec   :  { %v260_v20 = vadd.f32 %v255_v19, %v153_v16 }
  0xed   :  { %v2339_v21 = vpop.f32.mrf.mxu1 }
  0xee   :  { %v261_v22 = vmul.f32 %v260_v20, %v2908_v18 }
  0xf0   :  { %v2184_v23 = vmul.f32 -1.442695, %v261_v22  ;;  %v174_v22 = vld [vmem:[#allocation6 + $0x8] sm:$0xff] }
  0xf2   :  { %2583 = vpow2.f32 %v2184_v23 }
  0xff   :  { %v2584_v24 = vpop.eup %2583 }
 0x100   :  { %v265_v25 = vadd.f32 1.0, %v2584_v24 }
 0x102   :  { %2585 = vrcp.f32 %v265_v25 }
 0x10f   :  { %v2586_v26 = vpop.eup %2585 }
 0x110   :  { %v268_v28 = vmul.f32 %v2586_v26, %v2908_v18 }
 0x112   :  { %v269_v29 = vadd.f32 %v268_v28, %v2912_v27 }
 0x114   :  { %276 = vrot.lane.b32.xlu0 %v269_v29, %s2779_s18  ;;  %v274_v33 = vmul.f32 %v272_v32, %v269_v29 }
 0x186   :  { %v277_v30 = vpop.permute.xlu0 %276 }
 0x187   :  { %v279_v31 = vmul.f32 %v277_v30, %v269_v29 }
 0x189   :  { %281 = vrot.lane.b32.xlu1 %v279_v31, %s2777_s30 }
 0x18d   :  { %176 = vrot.lane.b32.xlu1 %v2182_v36, %s2777_s30 }
 0x191   :  { %99 = vperm.xlu1 %2582, %v84_v47  }
 0x1fb   :  { %v282_v34 = vpop.permute.xlu1 %281 }
 0x1fc   :  { %v2918_v35 = vadd.f32 %v282_v34, %v274_v33 }
 0x1fe   :  { %2587 = vtanh.f32 %v2918_v35 }
 0x1ff   :  { %v177_v42 = vpop.permute.xlu1 %176 }
 0x200   :  { %180 = vst.msk [vmem:[#allocation4] sm:$0xff] %vm179_vm5, %v177_v42 }
 0x20b   :  { %v2588_v41 = vpop.eup %2587 }
 0x20c   :  { %287 = vrot.lane.b32.xlu0 %v2588_v41, %s2779_s18  ;;  %v100_v52 = vpop.permute.xlu1 %99 }
 0x20d   :  { %v139_v53 = vmul.f32 %v2894_v11, %v100_v52 }
 0x20f   :  { %v154_v54 = vadd.f32 %v2905_v15, %v139_v53 }
 0x27e   :  { %v288_v48 = vpop.permute.xlu0 %287 }
 0x27f   :  { %v290_v49 = vmul.f32 %v288_v48, %v269_v29 }
 0x281   :  { %292 = vrot.lane.b32.xlu0 %v290_v49, %s2777_s30  ;;  %v85_v49 = vld [vmem:[%s3485_s0 + $0x10] sm:$0xff] }
 0x2f3   :  { %v293_v50 = vpop.permute.xlu0 %292 }
 0x2f4   :  { %295 = vst.msk [vmem:[#allocation4] sm:$0xff] %vm185_vm1, %v293_v50  ;;  %2368 = vmatmul.mubr.msk.f32.vlgmr.msra.gmra.mxu0 %vm185_vm1, %v293_v50 }
 0x2f5   :  { %2371 = vmatpush3.msra.mxu0 %v2928_v37  ;;  %2386 = vmatprep.mubr.msk.f32.mxu0 %vm2775_vm0, %v2774_v1 }
 0x2f6   :  { %2372 = vmatprep.subr.mxu0 %v2774_v1 }
 0x2f7   :  { %2373 = vmatpush3.msra.mxu0 %v2933_v38 }
 0x2f8   :  { %2374 = vmatprep.subr.mxu0 %v2774_v1 }
 0x2f9   :  { %2375 = vmatpush3.msra.mxu0 %v2940_v39 }
 0x2fa   :  { %2376 = vmatprep.subr.mxu0 %v2774_v1 }
 0x2fb   :  { %v296_v51 = vld [vmem:[#allocation4] sm:$0xff]  ;;  %2377 = vmatpush3.msra.mxu0 %v2947_v40 }
 0x2fc   :  { %2357 = vmatmul.mubr.msk.f32.vlgmr.msra.gmra.mxu1 %vm305_vm6, %v296_v51  ;;  %2378 = vmatprep.subr.mxu0 %v2774_v1 }
 0x2fd   :  { %2390 = vmatpush3.msra.mxu1 %v2857_v3  ;;  %2397 = vmatprep.mubr.msk.f32.mxu1 %vm2775_vm0, %v2774_v1 }
 0x2fe   :  { %2391 = vmatprep.subr.mxu1 %v2774_v1  ;;  %2379 = vmatpush3.msra.mxu0 %v2958_v43 }
 0x2ff   :  { %2392 = vmatpush3.msra.mxu1 %v2859_v4  ;;  %2380 = vmatprep.subr.mxu0 %v2774_v1 }
 0x300   :  { %2393 = vmatprep.subr.mxu1 %v2774_v1  ;;  %2381 = vmatpush3.msra.mxu0 %v2963_v44 }
 0x301   :  { %2394 = vmatpush3.msra.mxu1 %v2867_v6  ;;  %2382 = vmatprep.subr.mxu0 %v2774_v1 }
 0x302   :  { %2395 = vmatprep.subr.mxu1 %v2774_v1  ;;  %2383 = vmatpush3.msra.mxu0 %v2970_v45 }
 0x303   :  { %2396 = vmatpush3.msra.mxu1 %v2872_v8  ;;  %2384 = vmatprep.subr.mxu0 %v2774_v1 }
 0x304   :  { %2385 = vmatpush3.msra.mxu0 %v2977_v46  ;;  %2400 = vmatprep.subr.mxu1 %v2774_v1 }
 0x305   :  { %2419 = vmatprep.subr.mxu0 %v2774_v1 }
 0x3b4   :  { %v490_v55 = vpop.f32.mrf.mxu0 }
 0x3b5   :  { %v496_v56 = vadd.f32 %v490_v55, %v154_v54 }
 0x3b6   :  { %v2369_v57 = vpop.f32.mrf.mxu0 }
 0x3b7   :  { %v497_v58 = vmul.f32 %v496_v56, %v2908_v18 }
 0x3b9   :  { %v2188_v59 = vmul.f32 -1.442695, %v497_v58 }
 0x3bb   :  { %2589 = vpow2.f32 %v2188_v59 }
 0x3bc   :  { %v375_v61 = vpop.f32.mrf.mxu1 }
 0x3bd   :  { %v376_v62 = vadd.f32 %v3024_v60, %v375_v61 }
 0x3be   :  { %v2358_v63 = vpop.f32.mrf.mxu1 }
 0x3bf   :  { %v379_v0 = vmul.f32 %v376_v62, %v2908_v18 }
 0x3c1   :  { %v2186_v2 = vmul.f32 -1.442695, %v379_v0 }
 0x3c3   :  { %2591 = vpow2.f32 %v2186_v2 }
 0x3c8   :  { %v2590_v5 = vpop.eup %2589 }
 0x3c9   :  { %v501_v7 = vadd.f32 1.0, %v2590_v5 }
 0x3cb   :  { %2593 = vrcp.f32 %v501_v7 }
 0x3d0   :  { %v2592_v9 = vpop.eup %2591 }
 0x3d1   :  { %v383_v12 = vadd.f32 1.0, %v2592_v9 }
 0x3d3   :  { %2595 = vrcp.f32 %v383_v12 }
 0x3d8   :  { %v2594_v14 = vpop.eup %2593 }
 0x3d9   :  { %v504_v16 = vmul.f32 %v2594_v14, %v2908_v18 }
 0x3db   :  { %v505_v17 = vadd.f32 %v504_v16, %v2912_v27 }
 0x3dd   :  { %508 = vrot.lane.b32.xlu1 %v505_v17, %s2779_s18  ;;  %v506_v29 = vmul.f32 %v505_v17, %v2918_v35 }
 0x3e0   :  { %v2596_v19 = vpop.eup %2595 }
 0x3e1   :  { %v386_v20 = vmul.f32 %v2596_v19, %v2908_v18 }
 0x3e3   :  { %v387_v21 = vadd.f32 %v386_v20, %v2912_v27 }
 0x3e5   :  { %394 = vrot.lane.b32.xlu0 %v387_v21, %s2779_s18 }
 0x3e9   :  { %389 = vrot.lane.b32.xlu0 %v174_v22, %s2777_s30 }
 0x44f   :  { %v509_v23 = vpop.permute.xlu1 %508 }
 0x450   :  { %v511_v24 = vmul.f32 %v509_v23, %v505_v17 }
 0x452   :  { %513 = vrot.lane.b32.xlu0 %v511_v24, %s2777_s30 }
 0x457   :  { %v395_v25 = vpop.permute.xlu0 %394 }
 0x458   :  { %v397_v26 = vmul.f32 %v395_v25, %v387_v21 }
 0x45a   :  { %399 = vrot.lane.b32.xlu1 %v397_v26, %s2777_s30 }
 0x45b   :  { %v390_v28 = vpop.permute.xlu0 %389 }
 0x45c   :  { %v392_v32 = vmul.f32 %v390_v28, %v387_v21 }
 0x4c4   :  { %v514_v30 = vpop.permute.xlu0 %513 }
 0x4c5   :  { %v3038_v31 = vadd.f32 %v514_v30, %v506_v29 }
 0x4c7   :  { %2597 = vtanh.f32 %v3038_v31 }
 0x4cc   :  { %v400_v33 = vpop.permute.xlu1 %399 }
 0x4cd   :  { %v3041_v34 = vadd.f32 %v400_v33, %v392_v32 }
 0x4cf   :  { %2599 = vtanh.f32 %v3041_v34 }
 0x4d4   :  { %v2598_v36 = vpop.eup %2597 }
 0x4d5   :  { %519 = vrot.lane.b32.xlu0 %v2598_v36, %s2779_s18 }
 0x4dc   :  { %v2600_v41 = vpop.eup %2599 }
 0x4dd   :  { %405 = vrot.lane.b32.xlu1 %v2600_v41, %s2779_s18 }
 0x547   :  { %v520_v42 = vpop.permute.xlu0 %519 }
 0x548   :  { %v522_v47 = vmul.f32 %v520_v42, %v505_v17 }
 0x54a   :  { %524 = vrot.lane.b32.xlu0 %v522_v47, %s2777_s30 }
 0x54f   :  { %v406_v35 = vpop.permute.xlu1 %405 }
 0x550   :  { %v3047_v48 = vmul.f32 %v406_v35, %v387_v21 }
 0x552   :  { %410 = vrot.lane.b32.xlu1 %v3047_v48, %s2779_s18 }
 0x556   :  { %104 = vperm.xlu1 %2582, %v85_v49  }
 0x5bc   :  { %v525_v50 = vpop.permute.xlu0 %524 }
 0x5bd   :  { %2398 = vmatmul.mubr.msk.f32.vlgmr.msra.gmra.mxu1 %vm185_vm1, %v525_v50 }
 0x5be   :  { %2401 = vmatpush3.msra.mxu1 %v2928_v37  ;;  %2416 = vmatprep.mubr.msk.f32.mxu1 %vm2775_vm0, %v2774_v1 }
 0x5bf   :  { %2402 = vmatprep.subr.mxu1 %v2774_v1 }
 0x5c0   :  { %2403 = vmatpush3.msra.mxu1 %v2933_v38 }
 0x5c1   :  { %2404 = vmatprep.subr.mxu1 %v2774_v1 }
 0x5c2   :  { %2405 = vmatpush3.msra.mxu1 %v2940_v39 }
 0x5c3   :  { %2406 = vmatprep.subr.mxu1 %v2774_v1 }
 0x5c4   :  { %v411_v51 = vpop.permute.xlu1 %410  ;;  %2407 = vmatpush3.msra.mxu1 %v2947_v40 }
 0x5c5   :  { %413 = vst.msk [vmem:[#allocation4] sm:$0xff] %vm179_vm5, %v411_v51  ;;  %2408 = vmatprep.subr.mxu1 %v2774_v1 }
 0x5c6   :  { %527 = vst.msk [vmem:[#allocation4] sm:$0xff] %vm185_vm1, %v525_v50  ;;  %2409 = vmatpush3.msra.mxu1 %v2958_v43 }
 0x5c7   :  { %2410 = vmatprep.subr.mxu1 %v2774_v1 }
 0x5c8   :  { %2411 = vmatpush3.msra.mxu1 %v2963_v44 }
 0x5c9   :  { %2412 = vmatprep.subr.mxu1 %v2774_v1 }
 0x5ca   :  { %2413 = vmatpush3.msra.mxu1 %v2970_v45 }
 0x5cb   :  { %2414 = vmatprep.subr.mxu1 %v2774_v1 }
 0x5cc   :  { %2415 = vmatpush3.msra.mxu1 %v2977_v46 }
 0x5cd   :  { %v528_v52 = vld [vmem:[#allocation4] sm:$0xff]  ;;  %2449 = vmatprep.subr.mxu1 %v2774_v1 }
 0x5ce   :  { %2387 = vmatmul.mubr.msk.f32.vlgmr.msra.gmra.mxu0 %vm305_vm6, %v528_v52 }
 0x5cf   :  { %2420 = vmatpush3.msra.mxu0 %v2857_v3  ;;  %2427 = vmatprep.mubr.msk.f32.mxu0 %vm2775_vm0, %v2774_v1 }
 0x5d0   :  { %2421 = vmatprep.subr.mxu0 %v2774_v1 }
 0x5d1   :  { %2422 = vmatpush3.msra.mxu0 %v2859_v4  ;;  %v105_v53 = vpop.permute.xlu1 %104 }
 0x5d2   :  { %2423 = vmatprep.subr.mxu0 %v2774_v1  ;;  %v140_v54 = vmul.f32 %v2894_v11, %v105_v53 }
 0x5d3   :  { %2424 = vmatpush3.msra.mxu0 %v2867_v6 }
 0x5d4   :  { %2425 = vmatprep.subr.mxu0 %v2774_v1  ;;  %v155_v55 = vadd.f32 %v2905_v15, %v140_v54 }
 0x5d5   :  { %2426 = vmatpush3.msra.mxu0 %v2872_v8 }
 0x5d6   :  { %2430 = vmatprep.subr.mxu0 %v2774_v1 }
 0x67d   :  { %v718_v56 = vpop.f32.mrf.mxu1 }
 0x67e   :  { %v724_v57 = vadd.f32 %v718_v56, %v155_v55 }
 0x67f   :  { %v2399_v58 = vpop.f32.mrf.mxu1 }
 0x680   :  { %v725_v59 = vmul.f32 %v724_v57, %v2908_v18 }
 0x682   :  { %v2192_v61 = vmul.f32 -1.442695, %v725_v59 }
 0x684   :  { %2601 = vpow2.f32 %v2192_v61 }
 0x68e   :  { %v606_v62 = vpop.f32.mrf.mxu0 }
 0x68f   :  { %v607_v63 = vadd.f32 %v3024_v60, %v606_v62 }
 0x690   :  { %v2388_v0 = vpop.f32.mrf.mxu0 }
 0x691   :  { %v2602_v2 = vpop.eup %2601  ;;  %v610_v5 = vmul.f32 %v607_v63, %v2908_v18 }
 0x692   :  { %v729_v7 = vadd.f32 1.0, %v2602_v2 }
 0x693   :  { %v2190_v9 = vmul.f32 -1.442695, %v610_v5 }
 0x694   :  { %2603 = vrcp.f32 %v729_v7 }
 0x695   :  { %2605 = vpow2.f32 %v2190_v9 }
 0x6a1   :  { %v2604_v12 = vpop.eup %2603 }
 0x6a2   :  { %v2606_v14 = vpop.eup %2605  ;;  %v732_v16 = vmul.f32 %v2604_v12, %v2908_v18 }
 0x6a3   :  { %v614_v17 = vadd.f32 1.0, %v2606_v14 }
 0x6a4   :  { %v733_v19 = vadd.f32 %v732_v16, %v2912_v27 }
 0x6a5   :  { %2607 = vrcp.f32 %v614_v17 }
 0x6a6   :  { %736 = vrot.lane.b32.xlu1 %v733_v19, %s2779_s18  ;;  %v734_v28 = vmul.f32 %v733_v19, %v3038_v31 }
 0x6b2   :  { %v2608_v20 = vpop.eup %2607 }
 0x6b3   :  { %v617_v21 = vmul.f32 %v2608_v20, %v2908_v18 }
 0x6b5   :  { %v618_v22 = vadd.f32 %v617_v21, %v2912_v27 }
 0x6b7   :  { %621 = vrot.lane.b32.xlu0 %v618_v22, %s2779_s18  ;;  %v619_v33 = vmul.f32 %v618_v22, %v3041_v34  ;;  %v86_v34 = vld [vmem:[%s3485_s0 + $0x18] sm:$0xff] }
 0x718   :  { %v737_v23 = vpop.permute.xlu1 %736 }
 0x719   :  { %v739_v24 = vmul.f32 %v737_v23, %v733_v19 }
 0x71b   :  { %741 = vrot.lane.b32.xlu1 %v739_v24, %s2777_s30 }
 0x729   :  { %v622_v25 = vpop.permute.xlu0 %621 }
 0x72a   :  { %v624_v26 = vmul.f32 %v622_v25, %v618_v22 }
 0x72c   :  { %626 = vrot.lane.b32.xlu0 %v624_v26, %s2777_s30 }
 0x78d   :  { %v742_v29 = vpop.permute.xlu1 %741 }
 0x78e   :  { %v3100_v30 = vadd.f32 %v742_v29, %v734_v28 }
 0x790   :  { %2609 = vtanh.f32 %v3100_v30 }
 0x79d   :  { %v2610_v32 = vpop.eup %2609 }
 0x79e   :  { %747 = vrot.lane.b32.xlu1 %v2610_v32, %s2779_s18  ;;  %v627_v36 = vpop.permute.xlu0 %626 }
 0x79f   :  { %v3105_v41 = vadd.f32 %v627_v36, %v619_v33 }
 0x7a1   :  { %2611 = vtanh.f32 %v3105_v41 }
 0x7ae   :  { %v2612_v42 = vpop.eup %2611 }
 0x7af   :  { %632 = vrot.lane.b32.xlu0 %v2612_v42, %s2779_s18 }
 0x810   :  { %v748_v47 = vpop.permute.xlu1 %747 }
 0x811   :  { %v750_v31 = vmul.f32 %v748_v47, %v733_v19 }
 0x813   :  { %752 = vrot.lane.b32.xlu1 %v750_v31, %s2777_s30 }
 0x821   :  { %v633_v35 = vpop.permute.xlu0 %632 }
 0x822   :  { %v3110_v49 = vmul.f32 %v633_v35, %v618_v22 }
 0x824   :  { %637 = vrot.lane.b32.xlu0 %v3110_v49, %s2779_s18 }
 0x828   :  { %109 = vperm.xlu0 %2581, %v86_v34  }
 0x885   :  { %v753_v50 = vpop.permute.xlu1 %752 }
 0x886   :  { %2428 = vmatmul.mubr.msk.f32.vlgmr.msra.gmra.mxu0 %vm185_vm1, %v753_v50 }
 0x887   :  { %2431 = vmatpush3.msra.mxu0 %v2928_v37  ;;  %2446 = vmatprep.mubr.msk.f32.mxu0 %vm2775_vm0, %v2774_v1 }
 0x888   :  { %2432 = vmatprep.subr.mxu0 %v2774_v1 }
 0x889   :  { %2433 = vmatpush3.msra.mxu0 %v2933_v38 }
 0x88a   :  { %2434 = vmatprep.subr.mxu0 %v2774_v1 }
 0x88b   :  { %2435 = vmatpush3.msra.mxu0 %v2940_v39 }
 0x88c   :  { %2436 = vmatprep.subr.mxu0 %v2774_v1 }
 0x88d   :  { %2437 = vmatpush3.msra.mxu0 %v2947_v40 }
 0x88e   :  { %2438 = vmatprep.subr.mxu0 %v2774_v1 }
 0x88f   :  { %2439 = vmatpush3.msra.mxu0 %v2958_v43 }
 0x890   :  { %2440 = vmatprep.subr.mxu0 %v2774_v1 }
 0x891   :  { %2441 = vmatpush3.msra.mxu0 %v2963_v44 }
 0x892   :  { %2442 = vmatprep.subr.mxu0 %v2774_v1 }
 0x893   :  { %2443 = vmatpush3.msra.mxu0 %v2970_v45 }
 0x894   :  { %2444 = vmatprep.subr.mxu0 %v2774_v1 }
 0x895   :  { %2445 = vmatpush3.msra.mxu0 %v2977_v46 }
 0x896   :  { %v638_v51 = vpop.permute.xlu0 %637  ;;  %2479 = vmatprep.subr.mxu0 %v2774_v1 }
 0x897   :  { %640 = vst.msk [vmem:[#allocation4] sm:$0xff] %vm179_vm5, %v638_v51 }
 0x898   :  { %755 = vst.msk [vmem:[#allocation4] sm:$0xff] %vm185_vm1, %v753_v50 }
 0x89f   :  { %v756_v52 = vld [vmem:[#allocation4] sm:$0xff] }
 0x8a0   :  { %2417 = vmatmul.mubr.msk.f32.vlgmr.msra.gmra.mxu1 %vm305_vm6, %v756_v52 }
 0x8a1   :  { %2450 = vmatpush3.msra.mxu1 %v2857_v3  ;;  %2457 = vmatprep.mubr.msk.f32.mxu1 %vm2775_vm0, %v2774_v1 }
 0x8a2   :  { %2451 = vmatprep.subr.mxu1 %v2774_v1 }
 0x8a3   :  { %2452 = vmatpush3.msra.mxu1 %v2859_v4  ;;  %v110_v53 = vpop.permute.xlu0 %109 }
 0x8a4   :  { %2453 = vmatprep.subr.mxu1 %v2774_v1  ;;  %v141_v54 = vmul.f32 %v2894_v11, %v110_v53 }
 0x8a5   :  { %2454 = vmatpush3.msra.mxu1 %v2867_v6 }
 0x8a6   :  { %2455 = vmatprep.subr.mxu1 %v2774_v1  ;;  %v156_v55 = vadd.f32 %v2905_v15, %v141_v54 }
 0x8a7   :  { %2456 = vmatpush3.msra.mxu1 %v2872_v8 }
 0x8a8   :  { %2460 = vmatprep.subr.mxu1 %v2774_v1 }
 0x946   :  { %v946_v56 = vpop.f32.mrf.mxu0 }
 0x947   :  { %v952_v57 = vadd.f32 %v946_v56, %v156_v55 }
 0x948   :  { %v2429_v58 = vpop.f32.mrf.mxu0 }
 0x949   :  { %v953_v59 = vmul.f32 %v952_v57, %v2908_v18 }
 0x94b   :  { %v2196_v61 = vmul.f32 -1.442695, %v953_v59 }
 0x94d   :  { %2613 = vpow2.f32 %v2196_v61 }
 0x95a   :  { %v2614_v62 = vpop.eup %2613 }
 0x95b   :  { %v957_v63 = vadd.f32 1.0, %v2614_v62 }
 0x95d   :  { %2615 = vrcp.f32 %v957_v63 }
 0x960   :  { %v834_v0 = vpop.f32.mrf.mxu1 }
 0x961   :  { %v835_v2 = vadd.f32 %v3024_v60, %v834_v0 }
 0x962   :  { %v2418_v5 = vpop.f32.mrf.mxu1 }
 0x963   :  { %v838_v7 = vmul.f32 %v835_v2, %v2908_v18 }
 0x965   :  { %v2194_v9 = vmul.f32 -1.442695, %v838_v7 }
 0x967   :  { %2617 = vpow2.f32 %v2194_v9 }
 0x96a   :  { %v2616_v12 = vpop.eup %2615 }
 0x96b   :  { %v960_v14 = vmul.f32 %v2616_v12, %v2908_v18 }
 0x96d   :  { %v961_v16 = vadd.f32 %v960_v14, %v2912_v27 }
 0x96f   :  { %964 = vrot.lane.b32.xlu0 %v961_v16, %s2779_s18  ;;  %v962_v28 = vmul.f32 %v961_v16, %v3100_v30 }
 0x974   :  { %v2618_v17 = vpop.eup %2617 }
 0x975   :  { %v842_v19 = vadd.f32 1.0, %v2618_v17 }
 0x977   :  { %2619 = vrcp.f32 %v842_v19 }
 0x984   :  { %v2620_v20 = vpop.eup %2619 }
 0x985   :  { %v845_v21 = vmul.f32 %v2620_v20, %v2908_v18 }
 0x987   :  { %v846_v22 = vadd.f32 %v845_v21, %v2912_v27 }
 0x989   :  { %849 = vrot.lane.b32.xlu1 %v846_v22, %s2779_s18  ;;  %v847_v36 = vmul.f32 %v846_v22, %v3105_v41  ;;  %v87_v41 = vld [vmem:[%s3485_s0 + $0x20] sm:$0xff] }
 0x9e1   :  { %v965_v23 = vpop.permute.xlu0 %964 }
 0x9e2   :  { %v967_v24 = vmul.f32 %v965_v23, %v961_v16 }
 0x9e4   :  { %969 = vrot.lane.b32.xlu0 %v967_v24, %s2777_s30 }
 0x9fb   :  { %v850_v25 = vpop.permute.xlu1 %849 }
 0x9fc   :  { %v852_v26 = vmul.f32 %v850_v25, %v846_v22 }
 0x9fe   :  { %854 = vrot.lane.b32.xlu1 %v852_v26, %s2777_s30 }
 0xa56   :  { %v970_v29 = vpop.permute.xlu0 %969 }
 0xa57   :  { %v3163_v32 = vadd.f32 %v970_v29, %v962_v28 }
 0xa59   :  { %2621 = vtanh.f32 %v3163_v32 }
 0xa66   :  { %v2622_v33 = vpop.eup %2621 }
 0xa67   :  { %975 = vrot.lane.b32.xlu0 %v2622_v33, %s2779_s18 }
 0xa70   :  { %v855_v42 = vpop.permute.xlu1 %854 }
 0xa71   :  { %v3168_v47 = vadd.f32 %v855_v42, %v847_v36 }
 0xa73   :  { %2623 = vtanh.f32 %v3168_v47 }
 0xa80   :  { %v2624_v31 = vpop.eup %2623 }
 0xa81   :  { %860 = vrot.lane.b32.xlu1 %v2624_v31, %s2779_s18 }
 0xad9   :  { %v976_v35 = vpop.permute.xlu0 %975 }
 0xada   :  { %v978_v30 = vmul.f32 %v976_v35, %v961_v16 }
 0xadc   :  { %980 = vrot.lane.b32.xlu0 %v978_v30, %s2777_s30 }
 0xaf3   :  { %v861_v34 = vpop.permute.xlu1 %860 }
 0xaf4   :  { %v3173_v50 = vmul.f32 %v861_v34, %v846_v22 }
 0xaf6   :  { %865 = vrot.lane.b32.xlu1 %v3173_v50, %s2779_s18 }
 0xafa   :  { %114 = vperm.xlu1 %2582, %v87_v41  }
 0xb4e   :  { %v981_v51 = vpop.permute.xlu0 %980 }
 0xb4f   :  { %2458 = vmatmul.mubr.msk.f32.vlgmr.msra.gmra.mxu1 %vm185_vm1, %v981_v51 }
 0xb50   :  { %2461 = vmatpush3.msra.mxu1 %v2928_v37  ;;  %2476 = vmatprep.mubr.msk.f32.mxu1 %vm2775_vm0, %v2774_v1 }
 0xb51   :  { %2462 = vmatprep.subr.mxu1 %v2774_v1 }
 0xb52   :  { %2463 = vmatpush3.msra.mxu1 %v2933_v38 }
 0xb53   :  { %2464 = vmatprep.subr.mxu1 %v2774_v1 }
 0xb54   :  { %2465 = vmatpush3.msra.mxu1 %v2940_v39 }
 0xb55   :  { %2466 = vmatprep.subr.mxu1 %v2774_v1 }
 0xb56   :  { %2467 = vmatpush3.msra.mxu1 %v2947_v40 }
 0xb57   :  { %2468 = vmatprep.subr.mxu1 %v2774_v1 }
 0xb58   :  { %2469 = vmatpush3.msra.mxu1 %v2958_v43 }
 0xb59   :  { %2470 = vmatprep.subr.mxu1 %v2774_v1 }
 0xb5a   :  { %2471 = vmatpush3.msra.mxu1 %v2963_v44 }
 0xb5b   :  { %2472 = vmatprep.subr.mxu1 %v2774_v1 }
 0xb5c   :  { %2473 = vmatpush3.msra.mxu1 %v2970_v45 }
 0xb5d   :  { %2474 = vmatprep.subr.mxu1 %v2774_v1 }
 0xb5e   :  { %2475 = vmatpush3.msra.mxu1 %v2977_v46 }
 0xb5f   :  { %2509 = vmatprep.subr.mxu1 %v2774_v1 }
 0xb68   :  { %v866_v52 = vpop.permute.xlu1 %865 }
 0xb69   :  { %868 = vst.msk [vmem:[#allocation4] sm:$0xff] %vm179_vm5, %v866_v52 }
 0xb6a   :  { %983 = vst.msk [vmem:[#allocation4] sm:$0xff] %vm185_vm1, %v981_v51 }
 0xb71   :  { %v984_v53 = vld [vmem:[#allocation4] sm:$0xff] }
 0xb72   :  { %2447 = vmatmul.mubr.msk.f32.vlgmr.msra.gmra.mxu0 %vm305_vm6, %v984_v53 }
 0xb73   :  { %2480 = vmatpush3.msra.mxu0 %v2857_v3  ;;  %2487 = vmatprep.mubr.msk.f32.mxu0 %vm2775_vm0, %v2774_v1 }
 0xb74   :  { %2481 = vmatprep.subr.mxu0 %v2774_v1 }
 0xb75   :  { %2482 = vmatpush3.msra.mxu0 %v2859_v4  ;;  %v115_v54 = vpop.permute.xlu1 %114 }
 0xb76   :  { %2483 = vmatprep.subr.mxu0 %v2774_v1  ;;  %v142_v3 = vmul.f32 %v2894_v11, %v115_v54 }
 0xb77   :  { %2484 = vmatpush3.msra.mxu0 %v2867_v6 }
 0xb78   :  { %2485 = vmatprep.subr.mxu0 %v2774_v1  ;;  %v157_v55 = vadd.f32 %v2905_v15, %v142_v3 }
 0xb79   :  { %2486 = vmatpush3.msra.mxu0 %v2872_v8 }
 0xb7a   :  { %2490 = vmatprep.subr.mxu0 %v2774_v1 }
 0xc0f   :  { %v1174_v56 = vpop.f32.mrf.mxu1 }
 0xc10   :  { %v1180_v57 = vadd.f32 %v1174_v56, %v157_v55 }
 0xc11   :  { %v2459_v58 = vpop.f32.mrf.mxu1 }
 0xc12   :  { %v1181_v4 = vmul.f32 %v1180_v57, %v2908_v18 }
 0xc14   :  { %v2200_v59 = vmul.f32 -1.442695, %v1181_v4 }
 0xc16   :  { %2625 = vpow2.f32 %v2200_v59 }
 0xc23   :  { %v2626_v61 = vpop.eup %2625 }
 0xc24   :  { %v1185_v6 = vadd.f32 1.0, %v2626_v61 }
 0xc26   :  { %2627 = vrcp.f32 %v1185_v6 }
 0xc32   :  { %v1062_v62 = vpop.f32.mrf.mxu0 }
 0xc33   :  { %v2628_v63 = vpop.eup %2627  ;;  %v1063_v8 = vadd.f32 %v3024_v60, %v1062_v62 }
 0xc34   :  { %v2448_v0 = vpop.f32.mrf.mxu0  ;;  %v1188_v2 = vmul.f32 %v2628_v63, %v2908_v18 }
 0xc35   :  { %v1066_v5 = vmul.f32 %v1063_v8, %v2908_v18 }
 0xc36   :  { %v1189_v7 = vadd.f32 %v1188_v2, %v2912_v27 }
 0xc37   :  { %v2198_v9 = vmul.f32 -1.442695, %v1066_v5 }
 0xc38   :  { %1192 = vrot.lane.b32.xlu1 %v1189_v7, %s2779_s18  ;;  %v1190_v24 = vmul.f32 %v1189_v7, %v3163_v32 }
 0xc39   :  { %2629 = vpow2.f32 %v2198_v9 }
 0xc46   :  { %v2630_v12 = vpop.eup %2629 }
 0xc47   :  { %v1070_v14 = vadd.f32 1.0, %v2630_v12 }
 0xc49   :  { %2631 = vrcp.f32 %v1070_v14 }
 0xc56   :  { %v2632_v16 = vpop.eup %2631 }
 0xc57   :  { %v1073_v17 = vmul.f32 %v2632_v16, %v2908_v18 }
 0xc59   :  { %v1074_v19 = vadd.f32 %v1073_v17, %v2912_v27 }
 0xc5b   :  { %1077 = vrot.lane.b32.xlu0 %v1074_v19, %s2779_s18  ;;  %v1075_v29 = vmul.f32 %v1074_v19, %v3168_v47  ;;  %v88_v47 = vld [vmem:[%s3485_s0 + $0x28] sm:$0xff] }
 0xcaa   :  { %v1193_v20 = vpop.permute.xlu1 %1192 }
 0xcab   :  { %v1195_v21 = vmul.f32 %v1193_v20, %v1189_v7  ;;  %v1560_v20 = vld [vmem:[#allocation9 + $0x10] sm:$0xff] }
 0xcad   :  { %1197 = vrot.lane.b32.xlu1 %v1195_v21, %s2777_s30  ;;  %v1559_v21 = vld [vmem:[#allocation9 + $0x8] sm:$0xff] }
 0xccd   :  { %v1078_v22 = vpop.permute.xlu0 %1077 }
 0xcce   :  { %v1080_v23 = vmul.f32 %v1078_v22, %v1074_v19  ;;  %v1558_v22 = vld [vmem:[#allocation9] sm:$0xff] }
 0xcd0   :  { %1082 = vrot.lane.b32.xlu0 %v1080_v23, %s2777_s30 }
 0xd1f   :  { %v1198_v25 = vpop.permute.xlu1 %1197 }
 0xd20   :  { %v3226_v26 = vadd.f32 %v1198_v25, %v1190_v24 }
 0xd22   :  { %2633 = vtanh.f32 %v3226_v26 }
 0xd2f   :  { %v2634_v28 = vpop.eup %2633 }
 0xd30   :  { %1203 = vrot.lane.b32.xlu1 %v2634_v28, %s2779_s18 }
 0xd42   :  { %v1083_v33 = vpop.permute.xlu0 %1082 }
 0xd43   :  { %v3231_v36 = vadd.f32 %v1083_v33, %v1075_v29  ;;  %v89_v29 = vld [vmem:[%s3485_s0 + $0x30] sm:$0xff] }
 0xd45   :  { %2635 = vtanh.f32 %v3231_v36 }
 0xd52   :  { %v2636_v42 = vpop.eup %2635 }
 0xd53   :  { %1088 = vrot.lane.b32.xlu0 %v2636_v42, %s2779_s18 }
 0xda2   :  { %v1204_v31 = vpop.permute.xlu1 %1203 }
 0xda3   :  { %v1206_v32 = vmul.f32 %v1204_v31, %v1189_v7 }
 0xda5   :  { %1208 = vrot.lane.b32.xlu1 %v1206_v32, %s2777_s30  ;;  %v3317_v32 = vld [vmem:[%s3488_s3] ss:$0 sm:$0xff] }
 0xdc5   :  { %v1089_v35 = vpop.permute.xlu0 %1088 }
 0xdc6   :  { %v3236_v30 = vmul.f32 %v1089_v35, %v1074_v19  ;;  %v1561_v19 = vld [vmem:[#allocation9 + $0x18] sm:$0xff] }
 0xdc8   :  { %1093 = vrot.lane.b32.xlu0 %v3236_v30, %s2779_s18 }
 0xdcc   :  { %119 = vperm.xlu0 %2581, %v88_v47   ;;  %v3323_v47 = vld [vmem:[%s3489_s4] ss:$0 sm:$0xff] }
 0xe17   :  { %v1209_v34 = vpop.permute.xlu1 %1208 }
 0xe18   :  { %2488 = vmatmul.mubr.msk.f32.vlgmr.msra.gmra.mxu0 %vm185_vm1, %v1209_v34 }
 0xe19   :  { %2491 = vmatpush3.msra.mxu0 %v2928_v37  ;;  %2506 = vmatprep.mubr.msk.f32.mxu0 %vm2775_vm0, %v2774_v1 }
 0xe1a   :  { %2492 = vmatprep.subr.mxu0 %v2774_v1 }
 0xe1b   :  { %2493 = vmatpush3.msra.mxu0 %v2933_v38 }
 0xe1c   :  { %2494 = vmatprep.subr.mxu0 %v2774_v1 }
 0xe1d   :  { %2495 = vmatpush3.msra.mxu0 %v2940_v39 }
 0xe1e   :  { %2496 = vmatprep.subr.mxu0 %v2774_v1 }
 0xe1f   :  { %2497 = vmatpush3.msra.mxu0 %v2947_v40 }
 0xe20   :  { %2498 = vmatprep.subr.mxu0 %v2774_v1 }
 0xe21   :  { %2499 = vmatpush3.msra.mxu0 %v2958_v43 }
 0xe22   :  { %2500 = vmatprep.subr.mxu0 %v2774_v1 }
 0xe23   :  { %2501 = vmatpush3.msra.mxu0 %v2963_v44 }
 0xe24   :  { %2502 = vmatprep.subr.mxu0 %v2774_v1 }
 0xe25   :  { %2503 = vmatpush3.msra.mxu0 %v2970_v45 }
 0xe26   :  { %2504 = vmatprep.subr.mxu0 %v2774_v1 }
 0xe27   :  { %2505 = vmatpush3.msra.mxu0 %v2977_v46 }
 0xe28   :  { %2539 = vmatprep.subr.mxu0 %v2774_v1 }
 0xe3a   :  { %v1094_v37 = vpop.permute.xlu0 %1093 }
 0xe3b   :  { %1096 = vst.msk [vmem:[#allocation4] sm:$0xff] %vm179_vm5, %v1094_v37 }
 0xe3c   :  { %1211 = vst.msk [vmem:[#allocation4] sm:$0xff] %vm185_vm1, %v1209_v34 }
 0xe43   :  { %v1212_v38 = vld [vmem:[#allocation4] sm:$0xff] }
 0xe44   :  { %2477 = vmatmul.mubr.msk.f32.vlgmr.msra.gmra.mxu1 %vm305_vm6, %v1212_v38 }
 0xe45   :  { %2517 = vmatprep.mubr.msk.f32.mxu1 %vm2775_vm0, %v2774_v1  ;;  %2510 = vmatpush3.msra.mxu1 %v1561_v19 }
 0xe46   :  { %2511 = vmatprep.subr.mxu1 %v2774_v1 }
 0xe47   :  { %v120_v39 = vpop.permute.xlu0 %119  ;;  %2512 = vmatpush3.msra.mxu1 %v1560_v20 }
 0xe48   :  { %v143_v40 = vmul.f32 %v2894_v11, %v120_v39  ;;  %2513 = vmatprep.subr.mxu1 %v2774_v1 }
 0xe49   :  { %2514 = vmatpush3.msra.mxu1 %v1559_v21 }
 0xe4a   :  { %v158_v43 = vadd.f32 %v2905_v15, %v143_v40  ;;  %2515 = vmatprep.subr.mxu1 %v2774_v1 }
 0xe4b   :  { %2516 = vmatpush3.msra.mxu1 %v1558_v22 }
 0xe4c   :  { %2520 = vmatprep.subr.mxu1 %v2774_v1 }
 0xed8   :  { %v1402_v44 = vpop.f32.mrf.mxu0 }
 0xed9   :  { %v1408_v45 = vadd.f32 %v1402_v44, %v158_v43 }
 0xeda   :  { %v2489_v46 = vpop.f32.mrf.mxu0 }
 0xedb   :  { %v1409_v41 = vmul.f32 %v1408_v45, %v2908_v18 }
 0xedd   :  { %v2204_v51 = vmul.f32 -1.442695, %v1409_v41 }
 0xedf   :  { %2637 = vpow2.f32 %v2204_v51 }
 0xeec   :  { %v2638_v52 = vpop.eup %2637 }
 0xeed   :  { %v1413_v53 = vadd.f32 1.0, %v2638_v52 }
 0xeef   :  { %2639 = vrcp.f32 %v1413_v53 }
 0xefc   :  { %v2640_v54 = vpop.eup %2639 }
 0xefd   :  { %v1416_v3 = vmul.f32 %v2640_v54, %v2908_v18 }
 0xeff   :  { %v1417_v55 = vadd.f32 %v1416_v3, %v2912_v27 }
 0xf01   :  { %1420 = vrot.lane.b32.xlu0 %v1417_v55, %s2779_s18  ;;  %v1418_v5 = vmul.f32 %v1417_v55, %v3226_v26 }
 0xf04   :  { %v1290_v11 = vpop.f32.mrf.mxu1 }
 0xf05   :  { %v1291_v15 = vadd.f32 %v3024_v60, %v1290_v11 }
 0xf06   :  { %v2478_v56 = vpop.f32.mrf.mxu1 }
 0xf07   :  { %v1294_v57 = vmul.f32 %v1291_v15, %v2908_v18 }
 0xf09   :  { %v2202_v58 = vmul.f32 -1.442695, %v1294_v57 }
 0xf0b   :  { %2641 = vpow2.f32 %v2202_v58 }
 0xf18   :  { %v2642_v4 = vpop.eup %2641 }
 0xf19   :  { %v1298_v59 = vadd.f32 1.0, %v2642_v4 }
 0xf1b   :  { %2643 = vrcp.f32 %v1298_v59 }
 0xf28   :  { %v2644_v61 = vpop.eup %2643 }
 0xf29   :  { %v1301_v6 = vmul.f32 %v2644_v61, %v2908_v18 }
 0xf2b   :  { %v1302_v62 = vadd.f32 %v1301_v6, %v2912_v27 }
 0xf2d   :  { %1305 = vrot.lane.b32.xlu1 %v1302_v62, %s2779_s18  ;;  %v1303_v14 = vmul.f32 %v1302_v62, %v3231_v36 }
 0xf73   :  { %v1421_v63 = vpop.permute.xlu0 %1420 }
 0xf74   :  { %v1423_v8 = vmul.f32 %v1421_v63, %v1417_v55 }
 0xf76   :  { %1425 = vrot.lane.b32.xlu0 %v1423_v8, %s2777_s30 }
 0xf9f   :  { %v1306_v0 = vpop.permute.xlu1 %1305 }
 0xfa0   :  { %v1308_v2 = vmul.f32 %v1306_v0, %v1302_v62 }
 0xfa2   :  { %1310 = vrot.lane.b32.xlu1 %v1308_v2, %s2777_s30 }
 0xfe8   :  { %v1426_v7 = vpop.permute.xlu0 %1425 }
 0xfe9   :  { %v3281_v9 = vadd.f32 %v1426_v7, %v1418_v5 }
 0xfeb   :  { %2645 = vtanh.f32 %v3281_v9 }
 0xff8   :  { %v2646_v12 = vpop.eup %2645 }
 0xff9   :  { %1431 = vrot.lane.b32.xlu0 %v2646_v12, %s2779_s18  ;;  %v1675_v12 = vld [vmem:[%s3491_s6 + $0x30] sm:$0xff] }
0x1014   :  { %v1311_v16 = vpop.permute.xlu1 %1310 }
0x1015   :  { %v3286_v17 = vadd.f32 %v1311_v16, %v1303_v14  ;;  %v1674_v14 = vld [vmem:[%s3491_s6 + $0x28] sm:$0xff] }
0x1017   :  { %2647 = vtanh.f32 %v3286_v17 }
0x1024   :  { %v2648_v23 = vpop.eup %2647 }
0x1025   :  { %1316 = vrot.lane.b32.xlu1 %v2648_v23, %s2779_s18  ;;  %v1669_v23 = vld [vmem:[%s3491_s6] sm:$0xff] }
0x106b   :  { %v1432_v24 = vpop.permute.xlu0 %1431 }
0x106c   :  { %v1434_v25 = vmul.f32 %v1432_v24, %v1417_v55 }
0x106e   :  { %1436 = vrot.lane.b32.xlu0 %v1434_v25, %s2777_s30 }
0x1097   :  { %v1317_v26 = vpop.permute.xlu1 %1316 }
0x1098   :  { %v3295_v28 = vmul.f32 %v1317_v26, %v1302_v62  ;;  %v90_v26 = vld [vmem:[%s3485_s0 + $0x38] sm:$0xff] }
0x109a   :  { %1321 = vrot.lane.b32.xlu1 %v3295_v28, %s2779_s18 }
0x109e   :  { %124 = vperm.xlu1 %2582, %v89_v29  }
0x10e0   :  { %v1437_v33 = vpop.permute.xlu0 %1436 }
0x10e1   :  { %2518 = vmatmul.mubr.msk.f32.vlgmr.msra.gmra.mxu1 %vm185_vm1, %v1437_v33 }
0x10e2   :  { %2536 = vmatprep.mubr.msk.f32.mxu1 %vm2775_vm0, %v2774_v1 }
0x110c   :  { %v1322_v36 = vpop.permute.xlu1 %1321 }
0x110d   :  { %1324 = vst.msk [vmem:[#allocation4] sm:$0xff] %vm179_vm5, %v1322_v36 }
0x110e   :  { %1439 = vst.msk [vmem:[#allocation4] sm:$0xff] %vm185_vm1, %v1437_v33 }
0x1115   :  { %v1440_v42 = vld [vmem:[#allocation4] sm:$0xff] }
0x1116   :  { %2507 = vmatmul.mubr.msk.f32.vlgmr.msra.gmra.mxu0 %vm305_vm6, %v1440_v42 }
0x1117   :  { %2540 = vmatpush3.msra.mxu0 %v1561_v19  ;;  %2547 = vmatprep.mubr.msk.f32.mxu0 %vm2775_vm0, %v2774_v1  ;;  %v1673_v19 = vld [vmem:[%s3491_s6 + $0x20] sm:$0xff] }
0x1118   :  { %2541 = vmatprep.subr.mxu0 %v2774_v1 }
0x1119   :  { %2542 = vmatpush3.msra.mxu0 %v1560_v20  ;;  %v125_v31 = vpop.permute.xlu1 %124  ;;  %v1672_v20 = vld [vmem:[%s3491_s6 + $0x18] sm:$0xff] }
0x111a   :  { %2543 = vmatprep.subr.mxu0 %v2774_v1  ;;  %v144_v35 = vmul.f32 %v3317_v32, %v125_v31 }
0x111b   :  { %2544 = vmatpush3.msra.mxu0 %v1559_v21  ;;  %v1671_v21 = vld [vmem:[%s3491_s6 + $0x10] sm:$0xff] }
0x111c   :  { %2545 = vmatprep.subr.mxu0 %v2774_v1  ;;  %v159_v34 = vadd.f32 %v3323_v47, %v144_v35 }
0x111d   :  { %2546 = vmatpush3.msra.mxu0 %v1558_v22  ;;  %v1670_v22 = vld [vmem:[%s3491_s6 + $0x8] sm:$0xff] }
0x111e   :  { %2550 = vmatprep.subr.mxu0 %v2774_v1 }
0x11a1   :  { %v1630_v37 = vpop.f32.mrf.mxu1 }
0x11a2   :  { %v1636_v38 = vadd.f32 %v1630_v37, %v159_v34 }
0x11a3   :  { %v2519_v39 = vpop.f32.mrf.mxu1 }
0x11a4   :  { %v1637_v40 = vmul.f32 %v1636_v38, %v2908_v18 }
0x11a6   :  { %v2208_v43 = vmul.f32 -1.442695, %v1637_v40 }
0x11a8   :  { %2649 = vpow2.f32 %v2208_v43 }
0x11b5   :  { %v2650_v44 = vpop.eup %2649 }
0x11b6   :  { %v1641_v45 = vadd.f32 1.0, %v2650_v44 }
0x11b8   :  { %2651 = vrcp.f32 %v1641_v45 }
0x11c5   :  { %v2652_v46 = vpop.eup %2651 }
0x11c6   :  { %v1644_v41 = vmul.f32 %v2652_v46, %v2908_v18 }
0x11c8   :  { %v1645_v51 = vadd.f32 %v1644_v41, %v2912_v27 }
0x11ca   :  { %1648 = vrot.lane.b32.xlu1 %v1645_v51, %s2779_s18  ;;  %v1646_v6 = vmul.f32 %v1645_v51, %v3281_v9  ;;  %v1676_v9 = vld [vmem:[%s3491_s6 + $0x38] sm:$0xff] }
0x11cb   :  { %2521 = vmatpush3.msra.mxu1 %v1676_v9 }
0x11cc   :  { %2522 = vmatprep.subr.mxu1 %v2774_v1 }
0x11cd   :  { %2523 = vmatpush3.msra.mxu1 %v1675_v12 }
0x11ce   :  { %2524 = vmatprep.subr.mxu1 %v2774_v1 }
0x11cf   :  { %2525 = vmatpush3.msra.mxu1 %v1674_v14 }
0x11d0   :  { %2526 = vmatprep.subr.mxu1 %v2774_v1 }
0x11d1   :  { %2527 = vmatpush3.msra.mxu1 %v1673_v19 }
0x11d2   :  { %2528 = vmatprep.subr.mxu1 %v2774_v1 }
0x11d3   :  { %2529 = vmatpush3.msra.mxu1 %v1672_v20 }
0x11d4   :  { %2530 = vmatprep.subr.mxu1 %v2774_v1 }
0x11d5   :  { %2531 = vmatpush3.msra.mxu1 %v1671_v21 }
0x11d6   :  { %v1518_v52 = vpop.f32.mrf.mxu0  ;;  %2532 = vmatprep.subr.mxu1 %v2774_v1 }
0x11d7   :  { %v1519_v53 = vadd.f32 %v3024_v60, %v1518_v52  ;;  %2533 = vmatpush3.msra.mxu1 %v1670_v22 }
0x11d8   :  { %v2508_v54 = vpop.f32.mrf.mxu0  ;;  %2534 = vmatprep.subr.mxu1 %v2774_v1 }
0x11d9   :  { %v1522_v3 = vmul.f32 %v1519_v53, %v2908_v18  ;;  %2535 = vmatpush3.msra.mxu1 %v1669_v23 }
0x11db   :  { %v2206_v55 = vmul.f32 -1.442695, %v1522_v3 }
0x11dd   :  { %2653 = vpow2.f32 %v2206_v55 }
0x11ea   :  { %v2654_v11 = vpop.eup %2653 }
0x11eb   :  { %v1526_v15 = vadd.f32 1.0, %v2654_v11 }
0x11ed   :  { %2655 = vrcp.f32 %v1526_v15 }
0x11fa   :  { %v2656_v56 = vpop.eup %2655 }
0x11fb   :  { %v1529_v57 = vmul.f32 %v2656_v56, %v2908_v18 }
0x11fd   :  { %v1530_v58 = vadd.f32 %v1529_v57, %v2912_v27 }
0x11ff   :  { %1533 = vrot.lane.b32.xlu0 %v1530_v58, %s2779_s18  ;;  %v1531_v0 = vmul.f32 %v1530_v58, %v3286_v17 }
0x123c   :  { %v1649_v4 = vpop.permute.xlu1 %1648 }
0x123d   :  { %v1651_v59 = vmul.f32 %v1649_v4, %v1645_v51 }
0x123f   :  { %1653 = vrot.lane.b32.xlu1 %v1651_v59, %s2777_s30 }
0x1271   :  { %v1534_v60 = vpop.permute.xlu0 %1533 }
0x1272   :  { %v1536_v61 = vmul.f32 %v1534_v60, %v1530_v58 }
0x1274   :  { %1538 = vrot.lane.b32.xlu0 %v1536_v61, %s2777_s30 }
0x12b1   :  { %v1654_v62 = vpop.permute.xlu1 %1653 }
0x12b2   :  { %v3338_v63 = vadd.f32 %v1654_v62, %v1646_v6 }
0x12b4   :  { %2657 = vtanh.f32 %v3338_v63 }
0x12c1   :  { %v2658_v8 = vpop.eup %2657 }
0x12c2   :  { %1659 = vrot.lane.b32.xlu1 %v2658_v8, %s2779_s18 }
0x12e6   :  { %v1539_v2 = vpop.permute.xlu0 %1538 }
0x12e7   :  { %v3343_v5 = vadd.f32 %v1539_v2, %v1531_v0 }
0x12e9   :  { %2659 = vtanh.f32 %v3343_v5 }
0x12f6   :  { %v2660_v7 = vpop.eup %2659 }
0x12f7   :  { %1544 = vrot.lane.b32.xlu0 %v2660_v7, %s2779_s18 }
0x1334   :  { %v1660_v16 = vpop.permute.xlu1 %1659 }
0x1335   :  { %v1662_v17 = vmul.f32 %v1660_v16, %v1645_v51 }
0x1337   :  { %1664 = vrot.lane.b32.xlu1 %v1662_v17, %s2777_s30 }
0x1369   :  { %v1545_v24 = vpop.permute.xlu0 %1544 }
0x136a   :  { %v3379_v25 = vmul.f32 %v1545_v24, %v1530_v58 }
0x136c   :  { %1549 = vrot.lane.b32.xlu0 %v3379_v25, %s2779_s18 }
0x1370   :  { %129 = vperm.xlu0 %2581, %v90_v26  }
0x13a9   :  { %v1665_v29 = vpop.permute.xlu1 %1664 }
0x13aa   :  { %2548 = vmatmul.mubr.msk.f32.vlgmr.msra.gmra.mxu0 %vm185_vm1, %v1665_v29 }
0x13ab   :  { %2551 = vmatpush3.msra.mxu0 %v1676_v9  ;;  %2566 = vmatprep.mubr.msk.f32.mxu0 %vm2775_vm0, %v2774_v1 }
0x13ac   :  { %2552 = vmatprep.subr.mxu0 %v2774_v1 }
0x13ad   :  { %2553 = vmatpush3.msra.mxu0 %v1675_v12 }
0x13ae   :  { %2554 = vmatprep.subr.mxu0 %v2774_v1 }
0x13af   :  { %2555 = vmatpush3.msra.mxu0 %v1674_v14 }
0x13b0   :  { %2556 = vmatprep.subr.mxu0 %v2774_v1 }
0x13b1   :  { %2557 = vmatpush3.msra.mxu0 %v1673_v19 }
0x13b2   :  { %2558 = vmatprep.subr.mxu0 %v2774_v1 }
0x13b3   :  { %2559 = vmatpush3.msra.mxu0 %v1672_v20 }
0x13b4   :  { %2560 = vmatprep.subr.mxu0 %v2774_v1 }
0x13b5   :  { %2561 = vmatpush3.msra.mxu0 %v1671_v21 }
0x13b6   :  { %2562 = vmatprep.subr.mxu0 %v2774_v1 }
0x13b7   :  { %2563 = vmatpush3.msra.mxu0 %v1670_v22 }
0x13b8   :  { %2564 = vmatprep.subr.mxu0 %v2774_v1 }
0x13b9   :  { %2565 = vmatpush3.msra.mxu0 %v1669_v23 }
0x13de   :  { %v1550_v33 = vpop.permute.xlu0 %1549 }
0x13df   :  { %1552 = vst.msk [vmem:[#allocation4] sm:$0xff] %vm179_vm5, %v1550_v33 }
0x13e0   :  { %1667 = vst.msk [vmem:[#allocation4] sm:$0xff] %vm185_vm1, %v1665_v29 }
0x13e7   :  { %v1668_v36 = vld [vmem:[#allocation4] sm:$0xff] }
0x13e8   :  { %2537 = vmatmul.mubr.msk.f32.vlgmr.msra.gmra.mxu1 %vm305_vm6, %v1668_v36 }
0x13eb   :  { %v130_v42 = vpop.permute.xlu0 %129 }
0x13ec   :  { %v145_v31 = vmul.f32 %v3317_v32, %v130_v42 }
0x13ee   :  { %v160_v35 = vadd.f32 %v3323_v47, %v145_v31  ;;  %v2681_v47 = vld [vmem:[%s3492_s7] ss:$0 sm:$0xff] }
0x146a   :  { %v1858_v34 = vpop.f32.mrf.mxu0 }
0x146b   :  { %v1864_v37 = vadd.f32 %v1858_v34, %v160_v35 }
0x146c   :  { %v2549_v38 = vpop.f32.mrf.mxu0 }
0x146d   :  { %v1865_v39 = vmul.f32 %v1864_v37, %v2908_v18 }
0x146f   :  { %v2212_v1 = vmul.f32 -1.442695, %v1865_v39 }
0x1471   :  { %2661 = vpow2.f32 %v2212_v1 }
0x147e   :  { %v2662_v40 = vpop.eup %2661 }
0x147f   :  { %v1869_v43 = vadd.f32 1.0, %v2662_v40 }
0x1481   :  { %2663 = vrcp.f32 %v1869_v43 }
0x148e   :  { %v2664_v44 = vpop.eup %2663 }
0x148f   :  { %v1872_v45 = vmul.f32 %v2664_v44, %v2908_v18 }
0x1491   :  { %v1873_v46 = vadd.f32 %v1872_v45, %v2912_v27 }
0x1493   :  { %1876 = vrot.lane.b32.xlu0 %v1873_v46, %s2779_s18  ;;  %v1874_v59 = vmul.f32 %v1873_v46, %v3338_v63 }
0x14a8   :  { %v1746_v32 = vpop.f32.mrf.mxu1 }
0x14a9   :  { %v1747_v41 = vadd.f32 %v2681_v47, %v1746_v32 }
0x14aa   :  { %v2538_v51 = vpop.f32.mrf.mxu1 }
0x14ab   :  { %v1750_v52 = vmul.f32 %v1747_v41, %v2908_v18 }
0x14ad   :  { %v2210_v53 = vmul.f32 -1.442695, %v1750_v52 }
0x14af   :  { %2665 = vpow2.f32 %v2210_v53 }
0x14bc   :  { %v2666_v54 = vpop.eup %2665 }
0x14bd   :  { %v1754_v3 = vadd.f32 1.0, %v2666_v54 }
0x14bf   :  { %2667 = vrcp.f32 %v1754_v3 }
0x14cc   :  { %v2668_v55 = vpop.eup %2667 }
0x14cd   :  { %v1757_v11 = vmul.f32 %v2668_v55, %v2908_v18 }
0x14cf   :  { %v1758_v15 = vadd.f32 %v1757_v11, %v2912_v27 }
0x14d1   :  { %1761 = vrot.lane.b32.xlu1 %v1758_v15, %s2779_s18  ;;  %v1759_v62 = vmul.f32 %v1758_v15, %v3343_v5 }
0x1505   :  { %v1877_v56 = vpop.permute.xlu0 %1876 }
0x1506   :  { %v1879_v57 = vmul.f32 %v1877_v56, %v1873_v46 }
0x1508   :  { %1881 = vrot.lane.b32.xlu0 %v1879_v57, %s2777_s30 }
0x1543   :  { %v1762_v58 = vpop.permute.xlu1 %1761 }
0x1544   :  { %v1764_v4 = vmul.f32 %v1762_v58, %v1758_v15 }
0x1546   :  { %1766 = vrot.lane.b32.xlu1 %v1764_v4, %s2777_s30 }
0x157a   :  { %v1882_v60 = vpop.permute.xlu0 %1881 }
0x157b   :  { %v3415_v61 = vadd.f32 %v1882_v60, %v1874_v59  ;;  %v2216_v59 = vld [vmem:[#allocation5] ss:$0 sm:$0xff] }
0x157d   :  { %2669 = vtanh.f32 %v3415_v61 }
0x158a   :  { %v2670_v6 = vpop.eup %2669 }
0x158b   :  { %1887 = vrot.lane.b32.xlu0 %v2670_v6, %s2779_s18 }
0x15b8   :  { %v1767_v8 = vpop.permute.xlu1 %1766 }
0x15b9   :  { %v1769_v0 = vadd.f32 %v1767_v8, %v1759_v62 }
0x15bb   :  { %2671 = vtanh.f32 %v1769_v0 }
0x15c8   :  { %v2672_v2 = vpop.eup %2671 }
0x15c9   :  { %1772 = vrot.lane.b32.xlu1 %v2672_v2, %s2779_s18 }
0x15fd   :  { %v1888_v7 = vpop.permute.xlu0 %1887 }
0x15fe   :  { %v1890_v9 = vmul.f32 %v1888_v7, %v1873_v46 }
0x1600   :  { %1892 = vrot.lane.b32.xlu0 %v1890_v9, %s2777_s30 }
0x163b   :  { %v1773_v63 = vpop.permute.xlu1 %1772 }
0x163c   :  { %v1775_v12 = vmul.f32 %v1773_v63, %v1758_v15  ;;  %v2088_v63 = vshrl.u32 %v69_v10, 7 }
0x163e   :  { %1777 = vrot.lane.b32.xlu1 %v1775_v12, %s2779_s18 }
0x1672   :  { %v3423_v16 = vpop.permute.xlu0 %1892 }
0x16b0   :  { %v1778_v14 = vpop.permute.xlu1 %1777 }
0x16b1   :  { %1780 = vst.msk [vmem:[#allocation4] sm:$0xff] %vm179_vm5, %v1778_v14 }
0x16b2   :  { %1895 = vst.msk [vmem:[#allocation4] sm:$0xff] %vm185_vm1, %v3423_v16 }
0x16b9   :  { %v1896_v5 = vld [vmem:[#allocation4] sm:$0xff] }
0x16ba   :  { %2567 = vmatmul.mubr.msk.f32.vlgmr.msra.gmra.mxu0 %vm305_vm6, %v1896_v5 }
0x177a   :  { %v1974_v17 = vpop.f32.mrf.mxu0 }
0x177b   :  { %v1975_v19 = vadd.f32 %v2681_v47, %v1974_v17 }
0x177c   :  { %v2568_v20 = vpop.f32.mrf.mxu0 }
0x177d   :  { %v1978_v21 = vmul.f32 %v1975_v19, %v2908_v18 }
0x177f   :  { %v2214_v22 = vmul.f32 -1.442695, %v1978_v21 }
0x1781   :  { %2673 = vpow2.f32 %v2214_v22 }
0x178e   :  { %v2674_v23 = vpop.eup %2673 }
0x178f   :  { %v1982_v24 = vadd.f32 1.0, %v2674_v23 }
0x1791   :  { %2675 = vrcp.f32 %v1982_v24 }
0x179e   :  { %v2676_v26 = vpop.eup %2675 }
0x179f   :  { %v1985_v29 = vmul.f32 %v2676_v26, %v2908_v18 }
0x17a1   :  { %v1986_v33 = vadd.f32 %v1985_v29, %v2912_v27 }
0x17a3   :  { %1989 = vrot.lane.b32.xlu1 %v1986_v33, %s2779_s18  ;;  %v1987_v18 = vmul.f32 %v1986_v33, %v1769_v0 }
0x1815   :  { %v1990_v36 = vpop.permute.xlu1 %1989 }
0x1816   :  { %v1992_v42 = vmul.f32 %v1990_v36, %v1986_v33 }
0x1818   :  { %1994 = vrot.lane.b32.xlu0 %v1992_v42, %s2777_s30 }
0x181c   :  { %414 = vrot.lane.b32.xlu0 %v3047_v48, %s2777_s30  ;;  %v2215_v48 = vld [vmem:[%s3493_s8] ss:$0 sm:$0xff]  ;;  %s2780_s8 = smov [#allocation11]  }
0x1820   :  { %869 = vrot.lane.b32.xlu0 %v3173_v50, %s2777_s30 }
0x1824   :  { %1325 = vrot.lane.b32.xlu0 %v3295_v28, %s2777_s30 }
0x1828   :  { %1781 = vrot.lane.b32.xlu0 %v1775_v12, %s2777_s30 }
0x188a   :  { %v1995_v31 = vpop.permute.xlu0 %1994 }
0x188b   :  { %v1997_v27 = vadd.f32 %v1995_v31, %v1987_v18 }
0x188d   :  { %2677 = vtanh.f32 %v1997_v27 }
0x188e   :  { %v415_v35 = vpop.permute.xlu0 %414 }
0x188f   :  { %417 = vst.msk [vmem:[#allocation3] sm:$0xff] %vm185_vm1, %v415_v35 }
0x1892   :  { %v870_v34 = vpop.permute.xlu0 %869 }
0x1893   :  { %873 = vst.msk [vmem:[#allocation3 + $0x10] sm:$0xff] %vm185_vm1, %v870_v34 }
0x1896   :  { %v1326_v50 = vpop.permute.xlu0 %1325  ;;  %v2014_v37 = vld [vmem:[#allocation3] sm:$0xff] }
0x1897   :  { %1329 = vst.msk [vmem:[#allocation3 + $0x20] sm:$0xff] %vm185_vm1, %v1326_v50  ;;  %v2029_v28 = vmul.f32 %v2215_v48, %v2014_v37 }
0x1899   :  { %v2037_v38 = vsel %vm185_vm1, %v2029_v28, 0.0 }
0x189a   :  { %v2678_v39 = vpop.eup %2677  ;;  %2038 = vadd.xlane.f32.xlu0 %v2037_v38  ;;  %v1782_v1 = vpop.permute.xlu0 %1781  ;;  %v2016_v40 = vld [vmem:[#allocation3 + $0x10] sm:$0xff] }
0x189b   :  { %1785 = vst.msk [vmem:[#allocation3 + $0x30] sm:$0xff] %vm185_vm1, %v1782_v1  ;;  %2000 = vrot.lane.b32.xlu1 %v2678_v39, %s2779_s18  ;;  %v2031_v43 = vmul.f32 %v2215_v48, %v2016_v40 }
0x189d   :  { %v2043_v44 = vsel %vm185_vm1, %v2031_v43, 0.0 }
0x189e   :  { %2044 = vadd.xlane.f32.xlu0 %v2043_v44  ;;  %v2018_v55 = vld [vmem:[#allocation3 + $0x20] sm:$0xff] }
0x189f   :  { %641 = vrot.lane.b32.xlu1 %v3110_v49, %s2777_s30  ;;  %v2033_v15 = vmul.f32 %v2215_v48, %v2018_v55 }
0x18a1   :  { %v2049_v57 = vsel %vm185_vm1, %v2033_v15, 0.0 }
0x18a2   :  { %v2020_v56 = vld [vmem:[#allocation3 + $0x30] sm:$0xff] }
0x18a3   :  { %1097 = vrot.lane.b32.xlu1 %v3236_v30, %s2777_s30  ;;  %v2035_v58 = vmul.f32 %v2215_v48, %v2020_v56 }
0x18a5   :  { %v2055_v4 = vsel %vm185_vm1, %v2035_v58, 0.0 }
0x18a7   :  { %1553 = vrot.lane.b32.xlu1 %v3379_v25, %s2777_s30 }
0x190d   :  { %v2001_v45 = vpop.permute.xlu1 %2000 }
0x190e   :  { %v2003_v46 = vmul.f32 %v2001_v45, %v1986_v33 }
0x1910   :  { %2009 = vrot.lane.b32.xlu1 %v2003_v46, %s2777_s30 }
0x1911   :  { %v642_v32 = vpop.permute.xlu1 %641 }
0x1912   :  { %645 = vst.msk [vmem:[#allocation3 + $0x8] sm:$0xff] %vm185_vm1, %v642_v32 }
0x1915   :  { %v1098_v47 = vpop.permute.xlu1 %1097 }
0x1916   :  { %1101 = vst.msk [vmem:[#allocation3 + $0x18] sm:$0xff] %vm185_vm1, %v1098_v47 }
0x1919   :  { %v1554_v41 = vpop.permute.xlu1 %1553  ;;  %v2015_v54 = vld [vmem:[#allocation3 + $0x8] sm:$0xff] }
0x191a   :  { %1557 = vst.msk [vmem:[#allocation3 + $0x28] sm:$0xff] %vm185_vm1, %v1554_v41  ;;  %v2030_v3 = vmul.f32 %v2215_v48, %v2015_v54 }
0x191c   :  { %v2040_v11 = vsel %vm185_vm1, %v2030_v3, 0.0 }
0x191d   :  { %v2017_v49 = vld [vmem:[#allocation3 + $0x18] sm:$0xff] }
0x191e   :  { %v2032_v51 = vmul.f32 %v2215_v48, %v2017_v49 }
0x1920   :  { %v2046_v30 = vsel %vm185_vm1, %v2032_v51, 0.0 }
0x1921   :  { %2047 = vadd.xlane.f32.xlu0 %v2046_v30  ;;  %v2019_v52 = vld [vmem:[#allocation3 + $0x28] sm:$0xff] }
0x1922   :  { %v2034_v25 = vmul.f32 %v2215_v48, %v2019_v52 }
0x1923   :  { %v2039_v9 = vpop.xlane.xlu0 %2038 }
0x1924   :  { %v2052_v53 = vsel %vm185_vm1, %v2034_v25, 0.0 }
0x1925   :  { %2053 = vadd.xlane.f32.xlu0 %v2052_v53 }
0x1927   :  { %v2045_v17 = vpop.xlane.xlu0 %2044 }
0x1934   :  { %2041 = vadd.xlane.f32.xlu1 %v2040_v11 }
0x1938   :  { %2050 = vadd.xlane.f32.xlu1 %v2049_v57 }
0x193c   :  { %2056 = vadd.xlane.f32.xlu1 %v2055_v4 }
0x194d   :  { %2068 = vperm.xlu1 %2582, %v2216_v59  }
0x1951   :  { %2137 = vrot.lane.b32.xlu1 %v3415_v61, %s2777_s30  ;;  %v2089_v61 = vsub.s32 %v2897_v13, %v2088_v63  ;;  %s2155_s30 = sshll.u32 %s2780_s8, 4  ;;  %s2156_s30 = int_to_ptr.vmem [resolvable:$true] %s2155_s30 }
0x1952   :  { %s2722_s29 = scalar_lea.vmem %s2156_s30, 128  ;;  %p2727_p11 = scmp.lt.s32.totalorder %s2156_s30, %s2156_s30 }
0x1953   :  { %p2723_p10 = scmp.ne.s32.totalorder %s2156_s30, %s2722_s29  ;;  %p2728_p12 = scmp.lt.s32.totalorder %s2722_s29, %s2722_s29 }
0x1955   :  { %2141 = vrot.lane.b32.xlu1 %v1997_v27, %s2779_s18  ;;  %p2729_p13 = por %p2728_p12, %p2727_p11 }
0x1957   :  { %p2730_p0 = pnand %p2729_p13, %p2723_p10 }
0x1982   :  { %v2010_v60 = vpop.permute.xlu1 %2009 }
0x1983   :  { %2013 = vst.msk [vmem:[#allocation3 + $0x38] sm:$0xff] %vm185_vm1, %v2010_v60 }
0x198a   :  { %v2021_v6 = vld [vmem:[#allocation3 + $0x38] sm:$0xff] }
0x198b   :  { %v2036_v62 = vmul.f32 %v2215_v48, %v2021_v6 }
0x198d   :  { %v2058_v8 = vsel %vm185_vm1, %v2036_v62, 0.0 }
0x198e   :  { %2059 = vadd.xlane.f32.xlu0 %v2058_v8 }
0x19a4   :  { %2005 = vrot.lane.b32.xlu0 %v2003_v46, %s2779_s18  ;;  %s2781_s18 = smov [#allocation12]  }
0x19a5   :  { %s2165_s28 = sshll.u32 %s2781_s18, 4  ;;  %s2166_s28 = int_to_ptr.vmem [resolvable:$true] %s2165_s28 }
0x19aa   :  { %v2048_v22 = vpop.xlane.xlu0 %2047 }
0x19ae   :  { %v2054_v10 = vpop.xlane.xlu0 %2053 }
0x19bd   :  { %v2042_v0 = vpop.xlane.xlu1 %2041 }
0x19c1   :  { %v2051_v2 = vpop.xlane.xlu1 %2050 }
0x19c5   :  { %v2057_v7 = vpop.xlane.xlu1 %2056 }
0x19c9   :  { %v2069_v12 = vpop.permute.xlu1 %2068 }
0x19ca   :  { %v2071_v14 = vadd.f32 %v2069_v12, %v2039_v9  ;;  %v2072_v5 = vadd.f32 %v2069_v12, %v2042_v0  ;;  %v2073_v19 = vadd.f32 %v2069_v12, %v2045_v17  ;;  %v2074_v24 = vadd.f32 %v2069_v12, %v2048_v22 }
0x19cb   :  { %v2075_v29 = vadd.f32 %v2069_v12, %v2051_v2  ;;  %v2076_v42 = vadd.f32 %v2069_v12, %v2054_v10  ;;  %v2077_v31 = vadd.f32 %v2069_v12, %v2057_v7 }
0x19cc   :  { %v2090_v20 = vrot.slane %v2071_v14, %v2089_v61  ;;  %v2094_v21 = vrot.slane %v2072_v5, %v2089_v61  ;;  %v2098_v23 = vrot.slane %v2073_v19, %v2089_v61  ;;  %v2102_v36 = vrot.slane %v2074_v24, %v2089_v61 }
0x19cd   :  { %v2106_v13 = vrot.slane %v2075_v29, %v2089_v61  ;;  %v2110_v35 = vrot.slane %v2076_v42, %v2089_v61  ;;  %v2138_v34 = vpop.permute.xlu1 %2137  ;;  %v2114_v28 = vrot.slane %v2077_v31, %v2089_v61 }
0x19ce   :  { %v2120_v26 = vsel %vm2119_vm7, %v2094_v21, %v2090_v20 }
0x19cf   :  { %v2122_v33 = vsel %vm2121_vm8, %v2098_v23, %v2120_v26 }
0x19d0   :  { %v2124_v18 = vsel %vm2123_vm9, %v2102_v36, %v2122_v33 }
0x19d1   :  { %v2126_v27 = vsel %vm2125_vm10, %v2106_v13, %v2124_v18  ;;  %v2142_v44 = vpop.permute.xlu1 %2141 }
0x19d2   :  { %v2128_v37 = vsel %vm2127_vm11, %v2110_v35, %v2126_v27 }
0x19d3   :  { %v2130_v1 = vsel %vm2129_vm12, %v2114_v28, %v2128_v37 }
0x1a17   :  { %v2060_v48 = vpop.xlane.xlu0 %2059 }
0x1a18   :  { %v2078_v50 = vadd.f32 %v2069_v12, %v2060_v48 }
0x1a1a   :  { %v2118_v38 = vrot.slane %v2078_v50, %v2089_v61 }
0x1a1b   :  { %v2006_v39 = vpop.permute.xlu0 %2005 }
0x1a1c   :  { %2008 = vst.msk [vmem:[#allocation4] sm:$0xff] %vm179_vm5, %v2006_v39  ;;  %v2144_v40 = vsel %vm185_vm1, %v3423_v16, %v2006_v39  ;;  %v2132_v43 = vsel %vm2131_vm13, %v2118_v38, %v2130_v1 }
0x1a1d   :  { %v2145_v45 = vsel %vm305_vm6, %v2144_v40, %v2138_v34  ;;  %2135 = vst.msk [vmem:[#allocation11] sm:$0xff] %vm2134_vm14, %v2132_v43 }
0x1a1e   :  { %2733 = shalt.err (!%p2730_p0)
}
0x1a1f   :  { %2158 = dma.vmem_to_hbm [thread:$0]  %s2156_s30, 128, %s3495_s10, [#allocation8]   ;;  %v2147_v46 = vsel %vm2146_vm15, %v2145_v45, %v2142_v44 }
0x1a20   :  { %2148 = vst [vmem:[#allocation12] sm:$0xff] %v2147_v46  ;;  %s2742_s3 = scalar_lea.vmem %s2166_s28, 128  ;;  %p2747_p2 = scmp.lt.s32.totalorder %s2166_s28, %s2166_s28 }
0x1a21   :  { %p2743_p1 = scmp.ne.s32.totalorder %s2166_s28, %s2742_s3  ;;  %p2748_p3 = scmp.lt.s32.totalorder %s2742_s3, %s2742_s3 }
0x1a23   :  { %p2749_p4 = por %p2748_p3, %p2747_p2 }
0x1a25   :  { %p2750_p5 = pnand %p2749_p4, %p2743_p1 }
0x1a27   :  { %2753 = shalt.err (!%p2750_p5)
}
0x1a28   :  { %2168 = dma.vmem_to_hbm [thread:$0]  %s2166_s28, 128, %s3496_s11, [#allocation13]  }
0x1a29   :  { %2766 = dma.done.wait [#allocation8], 128  }
0x1a2a   :  { %2767 = vsyncadd [#allocation8], 4294967168 }
0x1a2b   :  { %2768 = dma.done.wait [#allocation13], 128  }
0x1a2c   :  { %2769 = vsyncadd [#allocation13], 4294967168 }
0x1a2d   :  { %2175 = vsyncpa [#allocation7], 1 }
0x1a2e   :  { %2176 = vsyncpa [#allocation10], 1 }
0x1a2f   :  { %2177 = vsyncpa [#allocation8], 1 }
0x1a30   :  { %2178 = vsyncpa [#allocation13], 1 }

</bundles_post_ra>
